<compile_context>
chip_gen: v7x
topology: tpu7x:2x2x1
jax: 0.10.0
libtpu: 0.0.40
codegen_flags: <defaults>
</compile_context>

<pallas_src>
import jax
import jax.numpy as jnp
from jax.experimental import pallas as pl
from jax.experimental.pallas import tpu as pltpu


def _l2_normalize(x, eps=1e-12):
    # matches torch.nn.functional.normalize(x, p=2, dim=-1): x / max(||x||, eps)
    sumsq = jnp.sum(x * x, axis=-1, keepdims=True)
    inv = jax.lax.rsqrt(jnp.maximum(sumsq, eps * eps))   # EUP rsqrt, exact enough
    return x * inv


def multistream_kernel(img_ref, convw_ref, convb_ref,
                       txt_ref, w1_ref, b1_ref, w2_ref, b2_ref,
                       crop_out_ref, text_out_ref):
    # ---- image stream: Conv2d(k=1) + AdaptiveAvgPool2d(1) + squeeze + L2 norm.
    # avgpool over HW commutes with the 1x1 conv (both linear); the 1/(H*W)
    # scale is pre-folded into convw, so we just sum over the lane (HW) axis.
    img = img_ref[...]                                    # (TB, C_img, HW)  native NCHW
    x_sum = jnp.sum(img, axis=-1)                         # (TB, C_img)      XLU lane reduce
    y_img = jnp.dot(x_sum, convw_ref[...],
                    preferred_element_type=jnp.float32) + convb_ref[...]
    crop_out_ref[...] = _l2_normalize(y_img)              # (TB, E) lane-dense store

    # ---- text stream: mean over seq (1/S folded into w1), mlp_text, L2 norm.
    txt = txt_ref[...]                                    # (TB, S, D_text)
    t_sum = jnp.sum(txt, axis=1)                          # (TB, D_text)     sublane reduce
    h = jnp.dot(t_sum, w1_ref[...],
                preferred_element_type=jnp.float32) + b1_ref[...]
    h = jnp.maximum(h, 0.0)                               # ReLU
    y_text = jnp.dot(h, w2_ref[...],
                     preferred_element_type=jnp.float32) + b2_ref[...]
    text_out_ref[...] = _l2_normalize(y_text)             # (TB, E)


def multistream_forward(params, img_feat_nchw, text_hidden, *, tb=8):
    """Pallas implementation of MultiStreamNetwork.forward (minimal config).

    img_feat_nchw: (B, C_img, H, W)  -- image encoder output (NCHW, like PyTorch)
    text_hidden:   (B, S, D_text)    -- text encoder last_hidden_state
    returns: (features_crops, features_texts, tau, cls_logits_results)
    """
    B, C_img, H, W = img_feat_nchw.shape
    _, S, D_text = text_hidden.shape
    E = params["conv_w"].shape[1]
    HW = H * W

    # Fold the mean scalings into the weights once (sum instead of mean in-kernel).
    conv_w = params["conv_w"] * jnp.float32(1.0 / HW)
    w1 = params["w1"] * jnp.float32(1.0 / S)

    # Native-layout image stream: free contiguous reshape, no NCHW->NHWC transpose.
    img = img_feat_nchw.reshape(B, C_img, HW)

    # Batch tiling with padding so the grid has uniform (TB, ...) blocks.
    TB = max(8, min(tb, B)) if B >= 8 else 8
    TB = min(TB, max(B, 8))
    n_steps = pl.cdiv(B, TB)
    Bp = n_steps * TB
    if Bp != B:
        pad = Bp - B
        img = jnp.pad(img, ((0, pad), (0, 0), (0, 0)))
        txt = jnp.pad(text_hidden, ((0, pad), (0, 0), (0, 0)))
    else:
        txt = text_hidden

    kern = pl.pallas_call(
        multistream_kernel,
        grid_spec=pltpu.PrefetchScalarGridSpec(
            num_scalar_prefetch=0,
            grid=(n_steps,),
            in_specs=[
                pl.BlockSpec((TB, C_img, HW), lambda b: (b, 0, 0)),   # image feats (NCHW)
                pl.BlockSpec((C_img, E),      lambda b: (0, 0)),      # conv1x1 W (pre-scaled)
                pl.BlockSpec((1, E),          lambda b: (0, 0)),      # conv1x1 b
                pl.BlockSpec((TB, S, D_text), lambda b: (b, 0, 0)),   # text hidden
                pl.BlockSpec((D_text, D_text), lambda b: (0, 0)),     # mlp W1 (pre-scaled)
                pl.BlockSpec((1, D_text),     lambda b: (0, 0)),      # mlp b1
                pl.BlockSpec((D_text, E),     lambda b: (0, 0)),      # mlp W2
                pl.BlockSpec((1, E),          lambda b: (0, 0)),      # mlp b2
            ],
            out_specs=[
                pl.BlockSpec((TB, E), lambda b: (b, 0)),              # lane-dense 2-D slab
                pl.BlockSpec((TB, E), lambda b: (b, 0)),
            ],
        ),
        out_shape=(
            jax.ShapeDtypeStruct((Bp, E), jnp.float32),
            jax.ShapeDtypeStruct((Bp, E), jnp.float32),
        ),
        compiler_params=pltpu.CompilerParams(dimension_semantics=("parallel",)),
    )

    feat_crop, feat_text = kern(
        img, conv_w, params["conv_b"],
        txt, w1, params["b1"], params["w2"], params["b2"])

    feat_crop = feat_crop[:B]   # drop batch padding; corresponds to .squeeze() result
    feat_text = feat_text[:B]

    features_crops = [feat_crop]
    features_texts = [feat_text]
    cls_logits_results = []     # INSTANCELOSS / ID_LOSS disabled
    return features_crops, features_texts, params["tau"], cls_logits_results


def _reference_forward(params, img_feat_nchw, text_hidden):
    """Pure-JAX reference matching the PyTorch semantics."""
    # fc_img: conv1x1 then adaptive avgpool(1) then squeeze then normalize
    y = jnp.einsum("bchw,ce->behw", img_feat_nchw, params["conv_w"]) \
        + params["conv_b"].reshape(1, -1, 1, 1)
    y = jnp.mean(y, axis=(2, 3))
    n = jnp.sqrt(jnp.sum(y * y, axis=-1, keepdims=True))
    feat_crop = y / jnp.maximum(n, 1e-12)
    # encode_text: mean over seq, mlp_text, normalize
    t = jnp.mean(text_hidden, axis=1)
    h = jnp.maximum(t @ params["w1"] + params["b1"], 0.0)
    yt = h @ params["w2"] + params["b2"]
    nt = jnp.sqrt(jnp.sum(yt * yt, axis=-1, keepdims=True))
    feat_text = yt / jnp.maximum(nt, 1e-12)
    return feat_crop, feat_text


if __name__ == "__main__":
    # Small synthetic shapes (real cfg would be C_img=2048, D_text=768, E=256).
    B, C_img, H, W = 16, 128, 8, 8
    S, D_text = 8, 128
    E = 128

    key = jax.random.PRNGKey(0)
    ks = jax.random.split(key, 8)

    params = {
        "conv_w": 0.05 * jax.random.normal(ks[0], (C_img, E), jnp.float32),
        "conv_b": 0.05 * jax.random.normal(ks[1], (1, E), jnp.float32),
        "w1":     0.05 * jax.random.normal(ks[2], (D_text, D_text), jnp.float32),
        "b1":     0.05 * jax.random.normal(ks[3], (1, D_text), jnp.float32),
        "w2":     0.05 * jax.random.normal(ks[4], (D_text, E), jnp.float32),
        "b2":     0.05 * jax.random.normal(ks[5], (1, E), jnp.float32),
        "tau":    jnp.ones((1,), jnp.float32),   # nn.Parameter(torch.ones(1))
    }

    img_feat = jax.random.normal(ks[6], (B, C_img, H, W), jnp.float32)   # encoder_img output
    text_hidden = jax.random.normal(ks[7], (B, S, D_text), jnp.float32)  # BERT last_hidden_state

    fwd = jax.jit(lambda p, i, t: multistream_forward(p, i, t, tb=8))
    feats_crops, feats_texts, tau, cls_logits = fwd(params, img_feat, text_hidden)
    jax.block_until_ready((feats_crops, feats_texts, tau))

    ref_crop, ref_text = _reference_forward(params, img_feat, text_hidden)
    assert feats_crops[0].shape == (B, E) and feats_texts[0].shape == (B, E)
    assert jnp.allclose(feats_crops[0], ref_crop, atol=1e-5, rtol=1e-5)
    assert jnp.allclose(feats_texts[0], ref_text, atol=1e-5, rtol=1e-5)
    assert tau.shape == (1,) and cls_logits == []

    print("KERNEL_OK")
</pallas_src>

<mosaic_0001>
module attributes {stable_mosaic.version = 11 : i64} {
  func.func @multistream_kernel(%arg0: i32, %arg1: memref<8x128x64xf32, #tpu.memory_space<vmem>>, %arg2: memref<128x128xf32, #tpu.memory_space<vmem>>, %arg3: memref<1x128xf32, #tpu.memory_space<vmem>>, %arg4: memref<8x8x128xf32, #tpu.memory_space<vmem>>, %arg5: memref<128x128xf32, #tpu.memory_space<vmem>>, %arg6: memref<1x128xf32, #tpu.memory_space<vmem>>, %arg7: memref<128x128xf32, #tpu.memory_space<vmem>>, %arg8: memref<1x128xf32, #tpu.memory_space<vmem>>, %arg9: memref<8x128xf32, #tpu.memory_space<vmem>>, %arg10: memref<8x128xf32, #tpu.memory_space<vmem>>) attributes {dimension_semantics = [#tpu.dimension_semantics<parallel>], iteration_bounds = array<i64: 2>, scalar_prefetch = 0 : i64, scratch_operands = 0 : i64, tpu.core_type = #tpu.core_type<tc>, window_params = [{transform_indices = @transform_0, window_bounds = array<i64: 8, 128, 64>}, {pipeline_mode = #tpu.pipeline_mode<synchronous>, transform_indices = @transform_1, window_bounds = array<i64: 128, 128>}, {pipeline_mode = #tpu.pipeline_mode<synchronous>, transform_indices = @transform_2, window_bounds = array<i64: 1, 128>}, {transform_indices = @transform_3, window_bounds = array<i64: 8, 8, 128>}, {pipeline_mode = #tpu.pipeline_mode<synchronous>, transform_indices = @transform_4, window_bounds = array<i64: 128, 128>}, {pipeline_mode = #tpu.pipeline_mode<synchronous>, transform_indices = @transform_5, window_bounds = array<i64: 1, 128>}, {pipeline_mode = #tpu.pipeline_mode<synchronous>, transform_indices = @transform_6, window_bounds = array<i64: 128, 128>}, {pipeline_mode = #tpu.pipeline_mode<synchronous>, transform_indices = @transform_7, window_bounds = array<i64: 1, 128>}, {transform_indices = @transform_8, window_bounds = array<i64: 8, 128>}, {transform_indices = @transform_9, window_bounds = array<i64: 8, 128>}]} {
    %c0 = arith.constant 0 : index
    %c0_0 = arith.constant 0 : index
    %c0_1 = arith.constant 0 : index
    %0 = vector.load %arg1[%c0, %c0_0, %c0_1] : memref<8x128x64xf32, #tpu.memory_space<vmem>>, vector<8x128x64xf32>
    %cst = arith.constant dense<0.000000e+00> : vector<8x128xf32>
    %1 = vector.multi_reduction <add>, %0, %cst [2] : vector<8x128x64xf32> to vector<8x128xf32>
    %c0_2 = arith.constant 0 : index
    %c0_3 = arith.constant 0 : index
    %2 = vector.load %arg2[%c0_2, %c0_3] : memref<128x128xf32, #tpu.memory_space<vmem>>, vector<128x128xf32>
    %cst_4 = arith.constant dense<0.000000e+00> : vector<8x128xf32>
    %3 = tpu.matmul %1, %2, %cst_4 {dimension_numbers = #tpu.dot_dimension_numbers<[1], [0], [0], [1], [0, 0, 1, 1], [], []>} : vector<8x128xf32>, vector<128x128xf32>, vector<8x128xf32> -> vector<8x128xf32>
    %c0_5 = arith.constant 0 : index
    %c0_6 = arith.constant 0 : index
    %4 = vector.load %arg3[%c0_5, %c0_6] : memref<1x128xf32, #tpu.memory_space<vmem>>, vector<1x128xf32>
    %5 = vector.broadcast %4 : vector<1x128xf32> to vector<8x128xf32>
    %6 = arith.addf %3, %5 : vector<8x128xf32>
    %7 = arith.mulf %6, %6 : vector<8x128xf32>
    %cst_7 = arith.constant dense<0.000000e+00> : vector<8xf32>
    %8 = vector.multi_reduction <add>, %7, %cst_7 [1] : vector<8x128xf32> to vector<8xf32>
    %9 = vector.shape_cast %8 : vector<8xf32> to vector<8x1xf32>
    %cst_8 = arith.constant 1.000000e-24 : f32
    %10 = vector.broadcast %cst_8 : f32 to vector<8x1xf32>
    %11 = arith.maximumf %9, %10 : vector<8x1xf32>
    %12 = math.rsqrt %11 : vector<8x1xf32>
    %13 = vector.broadcast %12 : vector<8x1xf32> to vector<8x128xf32>
    %14 = arith.mulf %6, %13 : vector<8x128xf32>
    %c0_9 = arith.constant 0 : index
    %c0_10 = arith.constant 0 : index
    %15 = vector.load %arg9[%c0_9, %c0_10] : memref<8x128xf32, #tpu.memory_space<vmem>>, vector<8x128xf32>
    tpu.vector_store %arg9[%c0_9, %c0_10], %14 {strides = array<i32>} : memref<8x128xf32, #tpu.memory_space<vmem>>, vector<8x128xf32>,
    %c0_11 = arith.constant 0 : index
    %c0_12 = arith.constant 0 : index
    %c0_13 = arith.constant 0 : index
    %16 = vector.load %arg4[%c0_11, %c0_12, %c0_13] : memref<8x8x128xf32, #tpu.memory_space<vmem>>, vector<8x8x128xf32>
    %cst_14 = arith.constant dense<0.000000e+00> : vector<8x128xf32>
    %17 = vector.multi_reduction <add>, %16, %cst_14 [1] : vector<8x8x128xf32> to vector<8x128xf32>
    %c0_15 = arith.constant 0 : index
    %c0_16 = arith.constant 0 : index
    %18 = vector.load %arg5[%c0_15, %c0_16] : memref<128x128xf32, #tpu.memory_space<vmem>>, vector<128x128xf32>
    %cst_17 = arith.constant dense<0.000000e+00> : vector<8x128xf32>
    %19 = tpu.matmul %17, %18, %cst_17 {dimension_numbers = #tpu.dot_dimension_numbers<[1], [0], [0], [1], [0, 0, 1, 1], [], []>} : vector<8x128xf32>, vector<128x128xf32>, vector<8x128xf32> -> vector<8x128xf32>
    %c0_18 = arith.constant 0 : index
    %c0_19 = arith.constant 0 : index
    %20 = vector.load %arg6[%c0_18, %c0_19] : memref<1x128xf32, #tpu.memory_space<vmem>>, vector<1x128xf32>
    %21 = vector.broadcast %20 : vector<1x128xf32> to vector<8x128xf32>
    %22 = arith.addf %19, %21 : vector<8x128xf32>
    %cst_20 = arith.constant 0.000000e+00 : f32
    %23 = vector.broadcast %cst_20 : f32 to vector<8x128xf32>
    %24 = arith.maximumf %22, %23 : vector<8x128xf32>
    %c0_21 = arith.constant 0 : index
    %c0_22 = arith.constant 0 : index
    %25 = vector.load %arg7[%c0_21, %c0_22] : memref<128x128xf32, #tpu.memory_space<vmem>>, vector<128x128xf32>
    %cst_23 = arith.constant dense<0.000000e+00> : vector<8x128xf32>
    %26 = tpu.matmul %24, %25, %cst_23 {dimension_numbers = #tpu.dot_dimension_numbers<[1], [0], [0], [1], [0, 0, 1, 1], [], []>} : vector<8x128xf32>, vector<128x128xf32>, vector<8x128xf32> -> vector<8x128xf32>
    %c0_24 = arith.constant 0 : index
    %c0_25 = arith.constant 0 : index
    %27 = vector.load %arg8[%c0_24, %c0_25] : memref<1x128xf32, #tpu.memory_space<vmem>>, vector<1x128xf32>
    %28 = vector.broadcast %27 : vector<1x128xf32> to vector<8x128xf32>
    %29 = arith.addf %26, %28 : vector<8x128xf32>
    %30 = arith.mulf %29, %29 : vector<8x128xf32>
    %cst_26 = arith.constant dense<0.000000e+00> : vector<8xf32>
    %31 = vector.multi_reduction <add>, %30, %cst_26 [1] : vector<8x128xf32> to vector<8xf32>
    %32 = vector.shape_cast %31 : vector<8xf32> to vector<8x1xf32>
    %cst_27 = arith.constant 1.000000e-24 : f32
    %33 = vector.broadcast %cst_27 : f32 to vector<8x1xf32>
    %34 = arith.maximumf %32, %33 : vector<8x1xf32>
    %35 = math.rsqrt %34 : vector<8x1xf32>
    %36 = vector.broadcast %35 : vector<8x1xf32> to vector<8x128xf32>
    %37 = arith.mulf %29, %36 : vector<8x128xf32>
    %c0_28 = arith.constant 0 : index
    %c0_29 = arith.constant 0 : index
    %38 = vector.load %arg10[%c0_28, %c0_29] : memref<8x128xf32, #tpu.memory_space<vmem>>, vector<8x128xf32>
    tpu.vector_store %arg10[%c0_28, %c0_29], %37 {strides = array<i32>} : memref<8x128xf32, #tpu.memory_space<vmem>>, vector<8x128xf32>,
    return
  }
  func.func @transform_0(%arg0: i32) -> (i32, i32, i32) {
    %c0_i32 = arith.constant 0 : i32
    %c0_i32_0 = arith.constant 0 : i32
    %c0_i32_1 = arith.constant 0 : i32
    return %arg0, %c0_i32, %c0_i32_0 : i32, i32, i32
  }
  func.func @transform_1(%arg0: i32) -> (i32, i32) {
    %c0_i32 = arith.constant 0 : i32
    %c0_i32_0 = arith.constant 0 : i32
    %c0_i32_1 = arith.constant 0 : i32
    return %c0_i32, %c0_i32_0 : i32, i32
  }
  func.func @transform_2(%arg0: i32) -> (i32, i32) {
    %c0_i32 = arith.constant 0 : i32
    %c0_i32_0 = arith.constant 0 : i32
    %c0_i32_1 = arith.constant 0 : i32
    return %c0_i32, %c0_i32_0 : i32, i32
  }
  func.func @transform_3(%arg0: i32) -> (i32, i32, i32) {
    %c0_i32 = arith.constant 0 : i32
    %c0_i32_0 = arith.constant 0 : i32
    %c0_i32_1 = arith.constant 0 : i32
    return %arg0, %c0_i32, %c0_i32_0 : i32, i32, i32
  }
  func.func @transform_4(%arg0: i32) -> (i32, i32) {
    %c0_i32 = arith.constant 0 : i32
    %c0_i32_0 = arith.constant 0 : i32
    %c0_i32_1 = arith.constant 0 : i32
    return %c0_i32, %c0_i32_0 : i32, i32
  }
  func.func @transform_5(%arg0: i32) -> (i32, i32) {
    %c0_i32 = arith.constant 0 : i32
    %c0_i32_0 = arith.constant 0 : i32
    %c0_i32_1 = arith.constant 0 : i32
    return %c0_i32, %c0_i32_0 : i32, i32
  }
  func.func @transform_6(%arg0: i32) -> (i32, i32) {
    %c0_i32 = arith.constant 0 : i32
    %c0_i32_0 = arith.constant 0 : i32
    %c0_i32_1 = arith.constant 0 : i32
    return %c0_i32, %c0_i32_0 : i32, i32
  }
  func.func @transform_7(%arg0: i32) -> (i32, i32) {
    %c0_i32 = arith.constant 0 : i32
    %c0_i32_0 = arith.constant 0 : i32
    %c0_i32_1 = arith.constant 0 : i32
    return %c0_i32, %c0_i32_0 : i32, i32
  }
  func.func @transform_8(%arg0: i32) -> (i32, i32) {
    %c0_i32 = arith.constant 0 : i32
    %c0_i32_0 = arith.constant 0 : i32
    return %arg0, %c0_i32 : i32, i32
  }
  func.func @transform_9(%arg0: i32) -> (i32, i32) {
    %c0_i32 = arith.constant 0 : i32
    %c0_i32_0 = arith.constant 0 : i32
    return %arg0, %c0_i32 : i32, i32
  }
}

</mosaic_0001>

<bundles_post_ra>
// kernel: _lambda_.1
= control target key start
LH: loop header
LB: loop body
LE: loop exit
PB: predicated region body
PF: predicated region fallthrough
CT: control target
= control target key end

     0   :  { %15 = vsyncpa [#allocation3], 0  ;;  %s3635_s0 = inlined_call_operand.vmem [shape: f32[16,128,64], index: 0, kind: input, shape index: {}]   ;;  %s3636_s1 = inlined_call_operand.vmem [shape: f32[128,128], index: 1, kind: input, shape index: {}]   ;;  %s3637_s2 = inlined_call_operand.vmem [shape: f32[1,128], index: 2, kind: input, shape index: {}]   ;;  %s3638_s3 = inlined_call_operand.vmem [shape: f32[16,8,128], index: 3, kind: input, shape index: {}]   ;;  %s3639_s4 = inlined_call_operand.vmem [shape: f32[128,128], index: 4, kind: input, shape index: {}]   ;;  %s3640_s5 = inlined_call_operand.vmem [shape: f32[1,128], index: 5, kind: input, shape index: {}]   ;;  %s3641_s6 = inlined_call_operand.vmem [shape: f32[128,128], index: 6, kind: input, shape index: {}]   ;;  %s3642_s7 = inlined_call_operand.vmem [shape: f32[1,128], index: 7, kind: input, shape index: {}]   ;;  %s3643_s8 = inlined_call_operand.hbm [shape: f32[16,128], index: 8, kind: output, shape index: {0}]   ;;  %s3644_s9 = inlined_call_operand.hbm [shape: f32[16,128], index: 9, kind: output, shape index: {1}]  }
   0x1   :  { %17 = vsyncpa [#allocation3 + $0x1], 0 }
   0x2   :  { %18 = vsyncpa [#allocation5], 0 }
   0x3   :  { %20 = vsyncpa [#allocation5 + $0x1], 0  ;;  %s2641_s30 = smov 0   ;;  %s2643_s10 = smov 0  }
   0x4   :  { %s2645_s11 = smov 0   ;;  %s2647_s12 = smov 0  }
   0x5 LB: > { %s2662_s13 = sadd.s32 4294967295, %s2584_s12   ;;  %s2190_s14 = sadd.s32 4294967294, %s2584_s12   ;;  %s2584_s12 = sphi %s2647_s12, %s3656_s12   ;;  %s2580_s11 = sphi %s2645_s11, %s3655_s11   ;;  %s2576_s10 = sphi %s2643_s10, %s3654_s10   ;;  %s2572_s30 = sphi %s2641_s30, %s3653_s30  }
   0x6   : > { %s2666_s15 = sadd.s32 1, %s2584_s12   ;;  %s211_s16 = sadd.s32 1, %s2580_s11 }
   0x7   : > { %s208_s17 = ssub.s32 %s2584_s12, %s2666_s15  ;;  %p221_p0 = scmp.ne.s32.totalorder %s2580_s11, %s2576_s10 }
   0x8   : > { %p209_p1 = scmp.eq.s32.totalorder %s208_s17, 0  ;;  %p222_p2 = scmp.eq.s32.totalorder %s2662_s13, 1 }
   0x9   : > { %p227_p3 = scmp.ne.s32.totalorder %s2576_s10, %s2572_s30  ;;  %p228_p4 = scmp.eq.s32.totalorder %s2190_s14, 1 }
   0xa   : > { %s2677_s18 = scalar_select %p209_p1, %s2580_s11, %s211_s16  }
   0xb   : > { %p2679_p5 = por %p222_p2, %p221_p0  ;;  %p2683_p6 = por %p228_p4, %p227_p3 }
   0xc   : > { %p2193_p7 = scmp.ge.s32.totalorder %s2584_s12, 1  ;;  %p309_p8 = scmp.lt.s32.totalorder %s2584_s12, 3 }
   0xe   : > { %p310_p9 = pnand %p2193_p7, %p309_p8 }
   0xf   : > { %s2196_s21 = sshll.u32 (!%p310_p9), %s2662_s13, 3  ;;  %vm497_vm0 = vcmask (!%p310_p9), 523264   ;;  %v1845_v58 = vld [vmem:[%s3639_s4] sm:$0xff] (!%p310_p9)  ;;  %v1846_v59 = vld [vmem:[%s3639_s4 + $0x8] sm:$0xff] (!%p310_p9)  ;;  %v2586_v63 = vmov (!%p310_p9), 0.0|0.0   ;;  %vm1697_vm1 = vcmask (!%p310_p9), 1041409  }
  0x10   : > { %313 = sbr.rel (%p310_p9) target bundleno = 847 (0x34f), region = 52  ;;  %p357_p10 = scmp.lt.s32.totalorder (!%p310_p9), %s2196_s21, 15  ;;  %v2392_v60 = vpack.c.bf16 (!%p310_p9), %v1846_v59, %v1845_v58  ;;  %2391 = vmatprep.subr.bf16.mxu1 (!%p310_p9), %v2586_v63  ;;  %2367 = vmatprep.subr.bf16.mxu0 (!%p310_p9), %v2586_v63  ;;  %vm1699_vm2 = vcmask (!%p310_p9), 1042434   ;;  %vm1701_vm3 = vcmask (!%p310_p9), 1043459   ;;  %vm1703_vm4 = vcmask (!%p310_p9), 1044484  }
  0x11   : > { %vm3645_vm5 = vmmov (!%p310_p9), 0   ;;  %vm1705_vm6 = vcmask (!%p310_p9), 1045509   ;;  %vm1707_vm7 = vcmask (!%p310_p9), 1046534   ;;  %vm1709_vm8 = vcmask (!%p310_p9), 1047559   ;;  %s3548_s29 = sand.u32 (!%p310_p9), 1, %s2576_s10   ;;  %s3647_s16 = sshll.u32 (!%p310_p9), %s2662_s13, 7 }
  0x12   : > { %2393 = vmatpush3.bf16.msra.mxu1 (!%p310_p9), %v2392_v60  ;;  %vm1044_vm9 = vcmask (!%p310_p9), 130112   ;;  %vm1051_vm10 = vcmask (!%p310_p9), 195712   ;;  %vm1058_vm11 = vcmask (!%p310_p9), 261312   ;;  %vm1065_vm12 = vcmask (!%p310_p9), 326912   ;;  %s3646_s14 = sshll.u32 (!%p310_p9), %s3548_s29, 3  ;;  %s2056_s26 = scalar_lea.sflag (!%p310_p9), [#allocation3], %s3548_s29 }
  0x13   : > { %2394 = vmatprep.subr.bf16.mxu1 (!%p310_p9), %v2586_v63  ;;  %vm1072_vm13 = vcmask (!%p310_p9), 392512   ;;  %vm1079_vm14 = vcmask (!%p310_p9), 458112   ;;  %vm1086_vm15 = vcmask (!%p310_p9), 523712   ;;  %s2589_s27 = smov (!%p310_p9), [#allocation2]  }
  0x14   : > { %s2494_s28 = sshll.u32 (!%p310_p9), %s2589_s27, 4  ;;  %s2495_s28 = int_to_ptr.vmem [resolvable:$false] %s2494_s28 }
  0x17   : > { %s3658_s21 = smov (!%p357_p10, %s2196_s21), 15 }
  0x18   : > { %s2210_s22 = sshll.u32 %s3658_s21, 7  ;;  %s2200_s17 = sshll.u32 %s3658_s21, 3 }
  0x19   : > { %s2696_s25 = scalar_lea.vmem %s3635_s0, %s2210_s22  ;;  %s2801_s24 = scalar_lea.vmem %s3638_s3, %s2200_s17 }
  0x1a   : > { %v385_v0 = vld [vmem:[%s2696_s25 + $0x80] sm:$0xff]  ;;  %v386_v2 = vld [vmem:[%s2696_s25 + $0x88] sm:$0xff]  ;;  %v387_v8 = vld [vmem:[%s2696_s25 + $0x90] sm:$0xff]  ;;  %s348_s17 = scalar_lea.vmem [#allocation2], %s3646_s14  ;;  %s3559_s21 = scalar_lea.hbm %s3643_s8, %s3647_s16 }
  0x1b   : > { %v369_v1 = vld [vmem:[%s2696_s25] sm:$0xff]  ;;  %v546_v3 = vsel %vm497_vm0, %v385_v0, 0.0  ;;  %v370_v5 = vld [vmem:[%s2696_s25 + $0x8] sm:$0xff]  ;;  %v549_v6 = vsel %vm497_vm0, %v386_v2, 0.0  ;;  %v371_v9 = vld [vmem:[%s2696_s25 + $0x10] sm:$0xff]  ;;  %v552_v10 = vsel %vm497_vm0, %v387_v8, 0.0 }
  0x1c   : > { %v498_v4 = vsel %vm497_vm0, %v369_v1, 0.0  ;;  %547 = vadd.xlane.f32.xlu1 %v546_v3  ;;  %v501_v7 = vsel %vm497_vm0, %v370_v5, 0.0  ;;  %v504_v11 = vsel %vm497_vm0, %v371_v9, 0.0  ;;  %v402_v12 = vld [vmem:[%s2696_s25 + $0x108] sm:$0xff]  ;;  %v401_v13 = vld [vmem:[%s2696_s25 + $0x100] sm:$0xff]  ;;  %v388_v16 = vld [vmem:[%s2696_s25 + $0x98] sm:$0xff] }
  0x1d   : > { %499 = vadd.xlane.f32.xlu0 %v498_v4  ;;  %v597_v14 = vsel %vm497_vm0, %v402_v12, 0.0  ;;  %v594_v15 = vsel %vm497_vm0, %v401_v13, 0.0  ;;  %v372_v17 = vld [vmem:[%s2696_s25 + $0x18] sm:$0xff]  ;;  %v555_v18 = vsel %vm497_vm0, %v388_v16, 0.0  ;;  %v417_v20 = vld [vmem:[%s2696_s25 + $0x180] sm:$0xff]  ;;  %v403_v21 = vld [vmem:[%s2696_s25 + $0x110] sm:$0xff] }
  0x1e   : > { %v507_v19 = vsel %vm497_vm0, %v372_v17, 0.0  ;;  %v642_v22 = vsel %vm497_vm0, %v417_v20, 0.0  ;;  %v600_v23 = vsel %vm497_vm0, %v403_v21, 0.0  ;;  %v373_v24 = vld [vmem:[%s2696_s25 + $0x20] sm:$0xff]  ;;  %v418_v25 = vld [vmem:[%s2696_s25 + $0x188] sm:$0xff]  ;;  %v404_v28 = vld [vmem:[%s2696_s25 + $0x118] sm:$0xff] }
  0x1f   : > { %v510_v26 = vsel %vm497_vm0, %v373_v24, 0.0  ;;  %v645_v27 = vsel %vm497_vm0, %v418_v25, 0.0  ;;  %v389_v29 = vld [vmem:[%s2696_s25 + $0xa0] sm:$0xff]  ;;  %v603_v30 = vsel %vm497_vm0, %v404_v28, 0.0  ;;  %v419_v33 = vld [vmem:[%s2696_s25 + $0x190] sm:$0xff]  ;;  %v374_v36 = vld [vmem:[%s2696_s25 + $0x28] sm:$0xff] }
  0x20   : > { %550 = vadd.xlane.f32.xlu1 %v549_v6  ;;  %v558_v31 = vsel %vm497_vm0, %v389_v29, 0.0  ;;  %v433_v32 = vld [vmem:[%s2696_s25 + $0x200] sm:$0xff]  ;;  %v648_v35 = vsel %vm497_vm0, %v419_v33, 0.0  ;;  %v434_v37 = vld [vmem:[%s2696_s25 + $0x208] sm:$0xff]  ;;  %v513_v38 = vsel %vm497_vm0, %v374_v36, 0.0  ;;  %v435_v44 = vld [vmem:[%s2696_s25 + $0x210] sm:$0xff] }
  0x21   : > { %502 = vadd.xlane.f32.xlu0 %v501_v7  ;;  %v690_v34 = vsel %vm497_vm0, %v433_v32, 0.0  ;;  %v693_v39 = vsel %vm497_vm0, %v434_v37, 0.0  ;;  %v405_v40 = vld [vmem:[%s2696_s25 + $0x120] sm:$0xff]  ;;  %v390_v41 = vld [vmem:[%s2696_s25 + $0xa8] sm:$0xff]  ;;  %v420_v45 = vld [vmem:[%s2696_s25 + $0x198] sm:$0xff]  ;;  %v696_v46 = vsel %vm497_vm0, %v435_v44, 0.0 }
  0x22   : > { %v606_v42 = vsel %vm497_vm0, %v405_v40, 0.0  ;;  %v561_v43 = vsel %vm497_vm0, %v390_v41, 0.0  ;;  %v651_v47 = vsel %vm497_vm0, %v420_v45, 0.0  ;;  %v450_v48 = vld [vmem:[%s2696_s25 + $0x288] sm:$0xff]  ;;  %v449_v49 = vld [vmem:[%s2696_s25 + $0x280] sm:$0xff]  ;;  %v391_v52 = vld [vmem:[%s2696_s25 + $0xb0] sm:$0xff] }
  0x23   : > { %v741_v50 = vsel %vm497_vm0, %v450_v48, 0.0  ;;  %v738_v51 = vsel %vm497_vm0, %v449_v49, 0.0  ;;  %v375_v53 = vld [vmem:[%s2696_s25 + $0x30] sm:$0xff]  ;;  %v564_v54 = vsel %vm497_vm0, %v391_v52, 0.0  ;;  %v421_v56 = vld [vmem:[%s2696_s25 + $0x1a0] sm:$0xff]  ;;  %v406_v57 = vld [vmem:[%s2696_s25 + $0x128] sm:$0xff] }
  0x24   : > { %553 = vadd.xlane.f32.xlu1 %v552_v10  ;;  %v516_v55 = vsel %vm497_vm0, %v375_v53, 0.0  ;;  %v654_v61 = vsel %vm497_vm0, %v421_v56, 0.0  ;;  %v609_v62 = vsel %vm497_vm0, %v406_v57, 0.0  ;;  %v451_v0 = vld [vmem:[%s2696_s25 + $0x290] sm:$0xff]  ;;  %v436_v1 = vld [vmem:[%s2696_s25 + $0x218] sm:$0xff]  ;;  %v466_v7 = vld [vmem:[%s2696_s25 + $0x308] sm:$0xff] }
  0x25   : > { %505 = vadd.xlane.f32.xlu0 %v504_v11  ;;  %v1847_v2 = vld [vmem:[%s3639_s4 + $0x10] sm:$0xff]  ;;  %v1848_v3 = vld [vmem:[%s3639_s4 + $0x18] sm:$0xff]  ;;  %v744_v5 = vsel %vm497_vm0, %v451_v0, 0.0  ;;  %v699_v6 = vsel %vm497_vm0, %v436_v1, 0.0  ;;  %v465_v8 = vld [vmem:[%s2696_s25 + $0x300] sm:$0xff]  ;;  %v789_v12 = vsel %vm497_vm0, %v466_v7, 0.0 }
  0x26   : > { %v2395_v4 = vpack.c.bf16 %v1848_v3, %v1847_v2  ;;  %v1849_v9 = vld [vmem:[%s3639_s4 + $0x20] sm:$0xff]  ;;  %v1850_v10 = vld [vmem:[%s3639_s4 + $0x28] sm:$0xff]  ;;  %v786_v13 = vsel %vm497_vm0, %v465_v8, 0.0  ;;  %v1851_v16 = vld [vmem:[%s3639_s4 + $0x30] sm:$0xff]  ;;  %s2074_s22 = sshll.u32 %s348_s17, 4  ;;  %s2496_s14 = scalar_lea.vmem %s2495_s28, 256  ;;  %s3561_s22 = int_to_ptr.vmem [resolvable:$true] %s2074_s22 }
  0x27   : > { %v2398_v11 = vpack.c.bf16 %v1850_v10, %v1849_v9  ;;  %v1852_v17 = vld [vmem:[%s3639_s4 + $0x38] sm:$0xff]  ;;  %v1789_v21 = vld [vmem:[%s2801_s24] sm:$0xff]  ;;  %v407_v24 = vld [vmem:[%s2696_s25 + $0x130] sm:$0xff]  ;;  %p2497_p0 = scmp.lt.s32.totalorder %s3561_s22, %s2495_s28 }
  0x28   : > { %598 = vadd.xlane.f32.xlu1 %v597_v14  ;;  %2396 = vmatpush3.bf16.msra.mxu1 %v2395_v4  ;;  %v392_v14 = vld [vmem:[%s2696_s25 + $0xb8] sm:$0xff]  ;;  %v1791_v25 = vld [vmem:[%s2801_s24 + $0x10] sm:$0xff]  ;;  %v1853_v28 = vld [vmem:[%s3639_s4 + $0x40] sm:$0xff] }
  0x29   : > { %595 = vadd.xlane.f32.xlu0 %v594_v15  ;;  %2397 = vmatprep.subr.bf16.mxu1 %v2586_v63  ;;  %v376_v15 = vld [vmem:[%s2696_s25 + $0x38] sm:$0xff]  ;;  %v1854_v29 = vld [vmem:[%s3639_s4 + $0x48] sm:$0xff]  ;;  %v1855_v49 = vld [vmem:[%s3639_s4 + $0x50] sm:$0xff] }
  0x2a   : > { %v519_v20 = vsel %vm497_vm0, %v376_v15, 0.0  ;;  %v452_v32 = vld [vmem:[%s2696_s25 + $0x298] sm:$0xff]  ;;  %v2404_v33 = vpack.c.bf16 %v1854_v29, %v1853_v28  ;;  %v1794_v40 = vld [vmem:[%s2801_s24 + $0x28] sm:$0xff]  ;;  %v481_v59 = vld [vmem:[%s2696_s25 + $0x380] sm:$0xff] }
  0x2b   : > { %v747_v48 = vsel %vm497_vm0, %v452_v32, 0.0  ;;  %v467_v0 = vld [vmem:[%s2696_s25 + $0x310] sm:$0xff]  ;;  %v1796_v1 = vld [vmem:[%s2801_s24 + $0x38] sm:$0xff]  ;;  %v1858_v7 = vld [vmem:[%s3639_s4 + $0x68] sm:$0xff]  ;;  %v834_v9 = vsel %vm497_vm0, %v481_v59, 0.0 }
  0x2c   : > { %556 = vadd.xlane.f32.xlu1 %v555_v18  ;;  %2399 = vmatpush3.bf16.msra.mxu1 %v2398_v11  ;;  %v2401_v18 = vpack.c.bf16 %v1852_v17, %v1851_v16  ;;  %v792_v11 = vsel %vm497_vm0, %v467_v0, 0.0  ;;  %v1839_v16 = vrot.slane %v1796_v1, 4  ;;  %v393_v32 = vld [vmem:[%s2696_s25 + $0xc0] sm:$0xff]  ;;  %v483_v0 = vld [vmem:[%s2696_s25 + $0x390] sm:$0xff] }
  0x2d   : > { %508 = vadd.xlane.f32.xlu0 %v507_v19  ;;  %2400 = vmatprep.subr.bf16.mxu1 %v2586_v63  ;;  %v567_v19 = vsel %vm497_vm0, %v392_v14, 0.0 }
  0x30   : > { %643 = vadd.xlane.f32.xlu1 %v642_v22  ;;  %v1790_v22 = vld [vmem:[%s2801_s24 + $0x8] sm:$0xff]  ;;  %2402 = vmatpush3.bf16.msra.mxu1 %v2401_v18 }
  0x31   : > { %601 = vadd.xlane.f32.xlu0 %v600_v23  ;;  %v422_v23 = vld [vmem:[%s2696_s25 + $0x1a8] sm:$0xff]  ;;  %2403 = vmatprep.subr.bf16.mxu1 %v2586_v63 }
  0x34   : > { %511 = vadd.xlane.f32.xlu1 %v510_v26  ;;  %v1797_v26 = vrot.slane %v1789_v21, 4  ;;  %2405 = vmatpush3.bf16.msra.mxu1 %v2404_v33 }
  0x35   : > { %646 = vadd.xlane.f32.xlu0 %v645_v27  ;;  %v1803_v27 = vrot.slane %v1790_v22, 4  ;;  %2406 = vmatprep.subr.bf16.mxu1 %v2586_v63 }
  0x37   : > { %v1804_v36 = vadd.f32 %v1803_v27, %v1790_v22  ;;  %v1860_v22 = vld [vmem:[%s3639_s4 + $0x78] sm:$0xff] }
  0x38   : > { %604 = vadd.xlane.f32.xlu1 %v603_v30  ;;  %v1792_v30 = vld [vmem:[%s2801_s24 + $0x18] sm:$0xff] }
  0x39   : > { %559 = vadd.xlane.f32.xlu0 %v558_v31  ;;  %v1809_v31 = vrot.slane %v1791_v25, 4  ;;  %v1815_v37 = vrot.slane %v1792_v30, 4  ;;  %v1805_v45 = vrot.slane %v1804_v36, 2 }
  0x3b   : > { %v1810_v41 = vadd.f32 %v1809_v31, %v1791_v25  ;;  %v1806_v56 = vadd.f32 %v1805_v45, %v1804_v36  ;;  %v408_v31 = vld [vmem:[%s2696_s25 + $0x138] sm:$0xff] }
  0x3c   : > { %691 = vadd.xlane.f32.xlu1 %v690_v34  ;;  %v1793_v34 = vld [vmem:[%s2801_s24 + $0x20] sm:$0xff] }
  0x3d   : > { %649 = vadd.xlane.f32.xlu0 %v648_v35  ;;  %v1798_v35 = vadd.f32 %v1797_v26, %v1789_v21  ;;  %v1811_v52 = vrot.slane %v1810_v41, 2  ;;  %v1807_v3 = vrot.slane %v1806_v56, 1  ;;  %v1859_v21 = vld [vmem:[%s3639_s4 + $0x70] sm:$0xff] }
  0x3e   : > { %v2413_v26 = vpack.c.bf16 %v1860_v22, %v1859_v21 }
  0x3f   : > { %v1799_v44 = vrot.slane %v1798_v35, 2  ;;  %v1812_v60 = vadd.f32 %v1811_v52, %v1810_v41  ;;  %v1808_v18 = vadd.f32 %v1807_v3, %v1806_v56  ;;  %v2588_v41 = vmov 0.0   ;;  %v453_v56 = vld [vmem:[%s2696_s25 + $0x2a0] sm:$0xff] }
  0x40   : > { %514 = vadd.xlane.f32.xlu1 %v513_v38  ;;  %v657_v38 = vsel %vm497_vm0, %v422_v23, 0.0  ;;  %2329 = vmatprep.mubr.msk.f32.mxu1 %vm3645_vm5, %v2588_v41  ;;  %v409_v3 = vld [vmem:[%s2696_s25 + $0x140] sm:$0xff] }
  0x41   : > { %694 = vadd.xlane.f32.xlu0 %v693_v39  ;;  %v612_v39 = vsel %vm497_vm0, %v407_v24, 0.0  ;;  %v1813_v14 = vrot.slane %v1812_v60, 1  ;;  %2294 = vmatprep.mubr.msk.f32.mxu0 %vm3645_vm5, %v2588_v41  ;;  %vm1093_vm5 = vcmask 589312  }
  0x43   : > { %v1814_v27 = vadd.f32 %v1813_v14, %v1812_v60 }
  0x44   : > { %607 = vadd.xlane.f32.xlu1 %v606_v42  ;;  %v1821_v42 = vrot.slane %v1793_v34, 4 }
  0x45   : > { %562 = vadd.xlane.f32.xlu0 %v561_v43  ;;  %v437_v43 = vld [vmem:[%s2696_s25 + $0x220] sm:$0xff] }
  0x46   : > { %v1822_v53 = vadd.f32 %v1821_v42, %v1793_v34  ;;  %v702_v58 = vsel %vm497_vm0, %v437_v43, 0.0  ;;  %v438_v43 = vld [vmem:[%s2696_s25 + $0x228] sm:$0xff] }
  0x48   : > { %697 = vadd.xlane.f32.xlu1 %v696_v46  ;;  %v1816_v46 = vadd.f32 %v1815_v37, %v1792_v30  ;;  %v1840_v30 = vadd.f32 %v1839_v16, %v1796_v1  ;;  %v484_v16 = vld [vmem:[%s2696_s25 + $0x398] sm:$0xff] }
  0x49   : > { %652 = vadd.xlane.f32.xlu0 %v651_v47  ;;  %v1827_v47 = vrot.slane %v1794_v40, 4 }
  0x4a   : > { %v1817_v57 = vrot.slane %v1816_v46, 2 }
  0x4c   : > { %742 = vadd.xlane.f32.xlu1 %v741_v50  ;;  %v1856_v50 = vld [vmem:[%s3639_s4 + $0x58] sm:$0xff]  ;;  %v1818_v4 = vadd.f32 %v1817_v57, %v1816_v46 }
  0x4d   : > { %739 = vadd.xlane.f32.xlu0 %v738_v51  ;;  %v1795_v51 = vld [vmem:[%s2801_s24 + $0x30] sm:$0xff]  ;;  %s2490_s24 = scalar_lea.vmem %s3561_s22, 128 }
  0x4e   : > { %p2491_p11 = scmp.ne.s32.totalorder %s3561_s22, %s2490_s24  ;;  %p2498_p1 = scmp.lt.s32.totalorder %s2496_s14, %s2490_s24 }
  0x50   : > { %565 = vadd.xlane.f32.xlu1 %v564_v54  ;;  %v2407_v54 = vpack.c.bf16 %v1856_v50, %v1855_v49  ;;  %p2492_p12 = pnand %p2491_p11, %p2679_p5  ;;  %p2499_p2 = por %p2498_p1, %p2497_p0 }
  0x51   : > { %517 = vadd.xlane.f32.xlu0 %v516_v55  ;;  %v1800_v55 = vadd.f32 %v1799_v44, %v1798_v35  ;;  %v423_v44 = vld [vmem:[%s2696_s25 + $0x1b0] sm:$0xff] }
  0x52   : > { %2408 = vmatpush3.bf16.msra.mxu1 %v2407_v54  ;;  %v660_v54 = vsel %vm497_vm0, %v423_v44, 0.0  ;;  %p2493_p13 = pneg %p2492_p12 }
  0x53   : > { %v1801_v2 = vrot.slane %v1800_v55, 1  ;;  %2409 = vmatprep.subr.bf16.mxu1 %v2586_v63 }
  0x54   : > { %655 = vadd.xlane.f32.xlu1 %v654_v61  ;;  %v1823_v61 = vrot.slane %v1822_v53, 2  ;;  %p2500_p3 = pnand %p2499_p2, %p2493_p13 }
  0x55   : > { %610 = vadd.xlane.f32.xlu0 %v609_v62  ;;  %v1828_v62 = vadd.f32 %v1827_v47, %v1794_v40  ;;  %v1802_v17 = vadd.f32 %v1801_v2, %v1800_v55  ;;  %v570_v40 = vsel %vm497_vm0, %v393_v32, 0.0  ;;  %v468_v55 = vld [vmem:[%s2696_s25 + $0x318] sm:$0xff]  ;;  %v840_v2 = vsel %vm497_vm0, %v483_v0, 0.0  ;;  %v485_v32 = vld [vmem:[%s2696_s25 + $0x3a0] sm:$0xff] }
  0x56   : > { %v1824_v8 = vadd.f32 %v1823_v61, %v1822_v53  ;;  %v705_v53 = vsel %vm497_vm0, %v438_v43, 0.0  ;;  %v795_v60 = vsel %vm497_vm0, %v468_v55, 0.0  ;;  %v750_v61 = vsel %vm497_vm0, %v453_v56, 0.0 }
  0x57   : > { %v1829_v15 = vrot.slane %v1828_v62, 2  ;;  %v1876_v34 = vsel %vm1697_vm1, %v1808_v18, %v1802_v17  ;;  %v843_v18 = vsel %vm497_vm0, %v484_v16, 0.0  ;;  %v427_v16 = vld [vmem:[%s2696_s25 + $0x1d0] sm:$0xff] }
  0x58   : > { %745 = vadd.xlane.f32.xlu1 %v744_v5  ;;  %v1833_v5 = vrot.slane %v1795_v51, 4  ;;  %v1825_v23 = vrot.slane %v1824_v8, 1  ;;  %v1877_v42 = vsel %vm1699_vm2, %v1814_v27, %v1876_v34  ;;  %v470_v27 = vld [vmem:[%s2696_s25 + $0x328] sm:$0xff]  ;;  %v846_v34 = vsel %vm497_vm0, %v485_v32, 0.0 }
  0x59   : > { %700 = vadd.xlane.f32.xlu0 %v699_v6  ;;  %v1857_v6 = vld [vmem:[%s3639_s4 + $0x60] sm:$0xff]  ;;  %v1830_v28 = vadd.f32 %v1829_v15, %v1828_v62  ;;  %v378_v62 = vld [vmem:[%s2696_s25 + $0x48] sm:$0xff]  ;;  %v379_v15 = vld [vmem:[%s2696_s25 + $0x50] sm:$0xff] }
  0x5a   : > { %v2410_v10 = vpack.c.bf16 %v1858_v7, %v1857_v6  ;;  %v1826_v35 = vadd.f32 %v1825_v23, %v1824_v8  ;;  %v525_v1 = vsel %vm497_vm0, %v378_v62, 0.0  ;;  %v439_v7 = vld [vmem:[%s2696_s25 + $0x230] sm:$0xff]  ;;  %v424_v8 = vld [vmem:[%s2696_s25 + $0x1b8] sm:$0xff]  ;;  %v528_v17 = vsel %vm497_vm0, %v379_v15, 0.0  ;;  %v442_v15 = vld [vmem:[%s2696_s25 + $0x248] sm:$0xff] }
  0x5b   : > { %v1831_v36 = vrot.slane %v1830_v28, 1  ;;  %v440_v23 = vld [vmem:[%s2696_s25 + $0x238] sm:$0xff] }
  0x5c   : > { %790 = vadd.xlane.f32.xlu1 %v789_v12  ;;  %v377_v12 = vld [vmem:[%s2696_s25 + $0x40] sm:$0xff]  ;;  %2411 = vmatpush3.bf16.msra.mxu1 %v2410_v10  ;;  %v663_v10 = vsel %vm497_vm0, %v424_v8, 0.0 }
  0x5d   : > { %787 = vadd.xlane.f32.xlu0 %v786_v13  ;;  %v482_v13 = vld [vmem:[%s2696_s25 + $0x388] sm:$0xff]  ;;  %2412 = vmatprep.subr.bf16.mxu1 %v2586_v63  ;;  %v522_v24 = vsel %vm497_vm0, %v377_v12, 0.0  ;;  %v1832_v45 = vadd.f32 %v1831_v36, %v1830_v28  ;;  %v455_v28 = vld [vmem:[%s2696_s25 + $0x2b0] sm:$0xff]  ;;  %v396_v36 = vld [vmem:[%s2696_s25 + $0xd8] sm:$0xff] }
  0x5e   : > { %v837_v25 = vsel %vm497_vm0, %v482_v13, 0.0  ;;  %v454_v12 = vld [vmem:[%s2696_s25 + $0x2a8] sm:$0xff] }
  0x5f   : > { %v753_v14 = vsel %vm497_vm0, %v454_v12, 0.0 }
  0x60   : > { %568 = vadd.xlane.f32.xlu1 %v567_v19  ;;  %v1819_v19 = vrot.slane %v1818_v4, 1  ;;  %2414 = vmatpush3.bf16.msra.mxu1 %v2413_v26 }
  0x61   : > { %520 = vadd.xlane.f32.xlu0 %v519_v20  ;;  %v1834_v20 = vadd.f32 %v1833_v5, %v1795_v51  ;;  %v618_v5 = vsel %vm497_vm0, %v409_v3, 0.0 }
  0x62   : > { %v1820_v33 = vadd.f32 %v1819_v19, %v1818_v4  ;;  %v394_v4 = vld [vmem:[%s2696_s25 + $0xc8] sm:$0xff] }
  0x63   : > { %v1835_v29 = vrot.slane %v1834_v20, 2  ;;  %v573_v6 = vsel %vm497_vm0, %v394_v4, 0.0  ;;  %v410_v19 = vld [vmem:[%s2696_s25 + $0x148] sm:$0xff] }
  0x64   : > { %658 = vadd.xlane.f32.xlu1 %v657_v38  ;;  %v1841_v38 = vrot.slane %v1840_v30, 2  ;;  %v621_v21 = vsel %vm497_vm0, %v410_v19, 0.0 }
  0x65   : > { %613 = vadd.xlane.f32.xlu0 %v612_v39  ;;  %v1836_v37 = vadd.f32 %v1835_v29, %v1834_v20  ;;  %v615_v39 = vsel %vm497_vm0, %v408_v31, 0.0  ;;  %v395_v20 = vld [vmem:[%s2696_s25 + $0xd0] sm:$0xff]  ;;  %v801_v29 = vsel %vm497_vm0, %v470_v27, 0.0  ;;  %v380_v31 = vld [vmem:[%s2696_s25 + $0x58] sm:$0xff] }
  0x66   : > { %v1842_v47 = vadd.f32 %v1841_v38, %v1840_v30  ;;  %v576_v22 = vsel %vm497_vm0, %v395_v20, 0.0  ;;  %v756_v30 = vsel %vm497_vm0, %v455_v28, 0.0  ;;  %v472_v27 = vld [vmem:[%s2696_s25 + $0x338] sm:$0xff]  ;;  %v457_v28 = vld [vmem:[%s2696_s25 + $0x2c0] sm:$0xff] }
  0x67   : > { %v1837_v46 = vrot.slane %v1836_v37, 1  ;;  %v807_v32 = vsel %vm497_vm0, %v472_v27, 0.0 }
  0x68   : > { %748 = vadd.xlane.f32.xlu1 %v747_v48  ;;  %v1878_v48 = vsel %vm1701_vm3, %v1820_v33, %v1877_v42  ;;  %v1843_v51 = vrot.slane %v1842_v47, 1  ;;  %v531_v33 = vsel %vm497_vm0, %v380_v31, 0.0  ;;  %v426_v42 = vld [vmem:[%s2696_s25 + $0x1c8] sm:$0xff] }
  0x69   : > { %703 = vadd.xlane.f32.xlu0 %v702_v58  ;;  %v1879_v49 = vsel %vm1703_vm4, %v1826_v35, %v1878_v48  ;;  %v1838_v50 = vadd.f32 %v1837_v46, %v1836_v37  ;;  %v411_v35 = vld [vmem:[%s2696_s25 + $0x150] sm:$0xff]  ;;  %v1033_v37 = vlaneseq  ;;  %v456_v48 = vld [vmem:[%s2696_s25 + $0x2b8] sm:$0xff] }
  0x6a   : > { %v1880_v52 = vsel %vm1705_vm6, %v1832_v45, %v1879_v49  ;;  %v1844_v57 = vadd.f32 %v1843_v51, %v1842_v47  ;;  %v624_v38 = vsel %vm497_vm0, %v411_v35, 0.0  ;;  %v669_v45 = vsel %vm497_vm0, %v426_v42, 0.0  ;;  %v471_v47 = vld [vmem:[%s2696_s25 + $0x330] sm:$0xff] }
  0x6b   : > { %v1881_v58 = vsel %vm1707_vm7, %v1838_v50, %v1880_v52  ;;  %v2922_v43 = vand.u32 127, %v1033_v37  ;;  %v2926_v46 = vshrl.u32 %v1033_v37, 7  ;;  %v804_v52 = vsel %vm497_vm0, %v471_v47, 0.0  ;;  %v487_v37 = vld [vmem:[%s2696_s25 + $0x3b0] sm:$0xff] }
  0x6c   : > { %835 = vadd.xlane.f32.xlu1 %v834_v9  ;;  %v1882_v59 = vsel %vm1709_vm8, %v1844_v57, %v1881_v58  ;;  %v708_v9 = vsel %vm497_vm0, %v439_v7, 0.0  ;;  %v381_v57 = vld [vmem:[%s2696_s25 + $0x60] sm:$0xff]  ;;  %v486_v58 = vld [vmem:[%s2696_s25 + $0x3a8] sm:$0xff]  ;;  %v852_v47 = vsel %vm497_vm0, %v487_v37, 0.0 }
  0x6d   : > { %793 = vadd.xlane.f32.xlu0 %v792_v11  ;;  %2330 = vmatmul.mubr.f32.vlgmr.msra.gmra.mrb[0].mxu1 %v1882_v59  ;;  %v469_v11 = vld [vmem:[%s2696_s25 + $0x320] sm:$0xff]  ;;  %v1039_v49 = vadd.s32 4294967288, %v2922_v43  ;;  %v2936_v55 = vsub.s32 %v2922_v43, %v2926_v46  ;;  %v849_v62 = vsel %vm497_vm0, %v486_v58, 0.0 }
  0x6e   : > { %v798_v13 = vsel %vm497_vm0, %v469_v11, 0.0 }
  0x6f   : > { %v2939_v56 = vsub.s32 %v1039_v49, %v2926_v46 }
  0x70   : > { %523 = vadd.xlane.f32.xlu1 %v522_v24  ;;  %v425_v24 = vld [vmem:[%s2696_s25 + $0x1c0] sm:$0xff] }
  0x71   : > { %838 = vadd.xlane.f32.xlu0 %v837_v25  ;;  %v711_v25 = vsel %vm497_vm0, %v440_v23, 0.0  ;;  %v666_v26 = vsel %vm497_vm0, %v425_v24, 0.0  ;;  %v672_v23 = vsel %vm497_vm0, %v427_v16, 0.0 }
  0x74   : > { %616 = vadd.xlane.f32.xlu1 %v615_v39  ;;  %v579_v39 = vsel %vm497_vm0, %v396_v36, 0.0  ;;  %v382_v36 = vld [vmem:[%s2696_s25 + $0x68] sm:$0xff] }
  0x75   : > { %571 = vadd.xlane.f32.xlu0 %v570_v40  ;;  %v441_v40 = vld [vmem:[%s2696_s25 + $0x240] sm:$0xff] }
  0x76   : > { %v714_v44 = vsel %vm497_vm0, %v441_v40, 0.0 }
  0x78   : > { %706 = vadd.xlane.f32.xlu1 %v705_v53  ;;  %v759_v53 = vsel %vm497_vm0, %v456_v48, 0.0 }
  0x79   : > { %661 = vadd.xlane.f32.xlu0 %v660_v54  ;;  %v1046_v54 = vadd.s32 4294967280, %v2922_v43 }
  0x7b   : > { %v2946_v0 = vsub.s32 %v1046_v54, %v2926_v46 }
  0x7c   : > { %796 = vadd.xlane.f32.xlu1 %v795_v60 }
  0x7d   : > { %751 = vadd.xlane.f32.xlu0 %v750_v61  ;;  %v534_v61 = vsel %vm497_vm0, %v381_v57, 0.0 }
  0x80   : > { %526 = vadd.xlane.f32.xlu1 %v525_v1 }
  0x81   : > { %841 = vadd.xlane.f32.xlu0 %v840_v2 }
  0x84   : > { %619 = vadd.xlane.f32.xlu1 %v618_v5  ;;  %v412_v5 = vld [vmem:[%s2696_s25 + $0x158] sm:$0xff] }
  0x85   : > { %574 = vadd.xlane.f32.xlu0 %v573_v6  ;;  %v397_v6 = vld [vmem:[%s2696_s25 + $0xe0] sm:$0xff]  ;;  %v627_v11 = vsel %vm497_vm0, %v412_v5, 0.0 }
  0x86   : > { %v582_v12 = vsel %vm497_vm0, %v397_v6, 0.0 }
  0x88   : > { %709 = vadd.xlane.f32.xlu1 %v708_v9 }
  0x89   : > { %664 = vadd.xlane.f32.xlu0 %v663_v10 }
  0x8c   : > { %799 = vadd.xlane.f32.xlu1 %v798_v13 }
  0x8d   : > { %754 = vadd.xlane.f32.xlu0 %v753_v14 }
  0x90   : > { %529 = vadd.xlane.f32.xlu1 %v528_v17  ;;  %v1053_v17 = vadd.s32 4294967272, %v2922_v43 }
  0x91   : > { %844 = vadd.xlane.f32.xlu0 %v843_v18 }
  0x94   : > { %622 = vadd.xlane.f32.xlu1 %v621_v21 }
  0x95   : > { %577 = vadd.xlane.f32.xlu0 %v576_v22  ;;  %v717_v22 = vsel %vm497_vm0, %v442_v15, 0.0 }
  0x98   : > { %712 = vadd.xlane.f32.xlu1 %v711_v25 }
  0x99   : > { %667 = vadd.xlane.f32.xlu0 %v666_v26  ;;  %v2970_v26 = vsub.s32 %v1053_v17, %v2926_v46 }
  0x9c   : > { %802 = vadd.xlane.f32.xlu1 %v801_v29 }
  0x9d   : > { %757 = vadd.xlane.f32.xlu0 %v756_v30 }
  0xa0   : > { %532 = vadd.xlane.f32.xlu1 %v531_v33  ;;  %v762_v33 = vsel %vm497_vm0, %v457_v28, 0.0 }
  0xa1   : > { %847 = vadd.xlane.f32.xlu0 %v846_v34 }
  0xa4   : > { %625 = vadd.xlane.f32.xlu1 %v624_v38  ;;  %v1060_v38 = vadd.s32 4294967264, %v2922_v43 }
  0xa5   : > { %580 = vadd.xlane.f32.xlu0 %v579_v39 }
  0xa6   : > { %v2988_v49 = vsub.s32 %v1060_v38, %v2926_v46 }
  0xa8   : > { %715 = vadd.xlane.f32.xlu1 %v714_v44 }
  0xa9   : > { %670 = vadd.xlane.f32.xlu0 %v669_v45  ;;  %v548_v50 = vpop.xlane.xlu1 %547  ;;  %v537_v45 = vsel %vm497_vm0, %v382_v36, 0.0 }
  0xaa   : > { %v500_v51 = vpop.xlane.xlu0 %499  ;;  %v1147_v1 = vrot.slane %v548_v50, %v2936_v55  ;;  %v413_v50 = vld [vmem:[%s2696_s25 + $0x160] sm:$0xff] }
  0xab   : > { %v1038_v2 = vrot.slane %v500_v51, %v2936_v55  ;;  %v398_v51 = vld [vmem:[%s2696_s25 + $0xe8] sm:$0xff]  ;;  %v630_v57 = vsel %vm497_vm0, %v413_v50, 0.0 }
  0xac   : > { %805 = vadd.xlane.f32.xlu1 %v804_v52  ;;  %v585_v58 = vsel %vm497_vm0, %v398_v51, 0.0 }
  0xad   : > { %760 = vadd.xlane.f32.xlu0 %v759_v53  ;;  %v551_v59 = vpop.xlane.xlu1 %550 }
  0xae   : > { %v503_v60 = vpop.xlane.xlu0 %502  ;;  %v1151_v3 = vrot.slane %v551_v59, %v2939_v56 }
  0xaf   : > { %v1043_v4 = vrot.slane %v503_v60, %v2939_v56 }
  0xb0   : > { %v1152_v7 = vsel %vm1044_vm9, %v1151_v3, %v1147_v1  ;;  %535 = vadd.xlane.f32.xlu1 %v534_v61  ;;  %v428_v1 = vld [vmem:[%s2696_s25 + $0x1d8] sm:$0xff] }
  0xb1   : > { %v1045_v8 = vsel %vm1044_vm9, %v1043_v4, %v1038_v2  ;;  %850 = vadd.xlane.f32.xlu0 %v849_v62  ;;  %v554_v9 = vpop.xlane.xlu1 %553  ;;  %v443_v62 = vld [vmem:[%s2696_s25 + $0x250] sm:$0xff] }
  0xb2   : > { %v506_v10 = vpop.xlane.xlu0 %505  ;;  %v1156_v13 = vrot.slane %v554_v9, %v2946_v0  ;;  %v720_v6 = vsel %vm497_vm0, %v443_v62, 0.0 }
  0xb3   : > { %v1050_v14 = vrot.slane %v506_v10, %v2946_v0  ;;  %v473_v10 = vld [vmem:[%s2696_s25 + $0x340] sm:$0xff] }
  0xb4   : > { %v1157_v18 = vsel %vm1051_vm10, %v1156_v13, %v1152_v7  ;;  %628 = vadd.xlane.f32.xlu1 %v627_v11  ;;  %v675_v7 = vsel %vm497_vm0, %v428_v1, 0.0  ;;  %v458_v11 = vld [vmem:[%s2696_s25 + $0x2c8] sm:$0xff]  ;;  %v810_v17 = vsel %vm497_vm0, %v473_v10, 0.0 }
  0xb5   : > { %v1052_v19 = vsel %vm1051_vm10, %v1050_v14, %v1045_v8  ;;  %583 = vadd.xlane.f32.xlu0 %v582_v12  ;;  %v599_v20 = vpop.xlane.xlu1 %598  ;;  %v1067_v12 = vadd.s32 4294967256, %v2922_v43 }
  0xb6   : > { %v596_v21 = vpop.xlane.xlu0 %595  ;;  %v1230_v24 = vrot.slane %v599_v20, %v2939_v56 }
  0xb7   : > { %v1226_v25 = vrot.slane %v596_v21, %v2936_v55  ;;  %v3015_v20 = vsub.s32 %v1067_v12, %v2926_v46  ;;  %v383_v21 = vld [vmem:[%s2696_s25 + $0x70] sm:$0xff] }
  0xb8   : > { %718 = vadd.xlane.f32.xlu1 %v717_v22  ;;  %v488_v22 = vld [vmem:[%s2696_s25 + $0x3b8] sm:$0xff]  ;;  %v540_v27 = vsel %vm497_vm0, %v383_v21, 0.0 }
  0xb9   : > { %v1231_v29 = vsel %vm1044_vm9, %v1230_v24, %v1226_v25  ;;  %673 = vadd.xlane.f32.xlu0 %v672_v23  ;;  %v557_v30 = vpop.xlane.xlu1 %556  ;;  %v855_v28 = vsel %vm497_vm0, %v488_v22, 0.0 }
  0xba   : > { %v509_v31 = vpop.xlane.xlu0 %508  ;;  %v1161_v34 = vrot.slane %v557_v30, %v2970_v26 }
  0xbb   : > { %v1057_v35 = vrot.slane %v509_v31, %v2970_v26 }
  0xbc   : > { %v1162_v39 = vsel %vm1058_vm11, %v1161_v34, %v1157_v18  ;;  %808 = vadd.xlane.f32.xlu1 %v807_v32  ;;  %v765_v18 = vsel %vm497_vm0, %v458_v11, 0.0  ;;  %v414_v32 = vld [vmem:[%s2696_s25 + $0x168] sm:$0xff] }
  0xbd   : > { %v1059_v40 = vsel %vm1058_vm11, %v1057_v35, %v1052_v19  ;;  %763 = vadd.xlane.f32.xlu0 %v762_v33  ;;  %v644_v42 = vpop.xlane.xlu1 %643  ;;  %v399_v33 = vld [vmem:[%s2696_s25 + $0xf0] sm:$0xff]  ;;  %v633_v38 = vsel %vm497_vm0, %v414_v32, 0.0 }
  0xbe   : > { %v602_v44 = vpop.xlane.xlu0 %601  ;;  %v1305_v59 = vrot.slane %v644_v42, %v2936_v55 }
  0xbf   : > { %v1235_v48 = vrot.slane %v602_v44, %v2946_v0  ;;  %v444_v44 = vld [vmem:[%s2696_s25 + $0x258] sm:$0xff] }
  0xc0   : > { %538 = vadd.xlane.f32.xlu1 %v537_v45  ;;  %v429_v45 = vld [vmem:[%s2696_s25 + $0x1e0] sm:$0xff] }
  0xc1   : > { %v1236_v52 = vsel %vm1051_vm10, %v1235_v48, %v1231_v29  ;;  %853 = vadd.xlane.f32.xlu0 %v852_v47  ;;  %v512_v53 = vpop.xlane.xlu1 %511 }
  0xc2   : > { %v647_v54 = vpop.xlane.xlu0 %646  ;;  %v1064_v60 = vrot.slane %v512_v53, %v2988_v49  ;;  %v678_v53 = vsel %vm497_vm0, %v429_v45, 0.0 }
  0xc3   : > { %v1309_v61 = vrot.slane %v647_v54, %v2939_v56 }
  0xc4   : > { %v1066_v2 = vsel %vm1065_vm12, %v1064_v60, %v1059_v40  ;;  %631 = vadd.xlane.f32.xlu1 %v630_v57  ;;  %v1074_v60 = vadd.s32 4294967248, %v2922_v43 }
  0xc5   : > { %v1310_v3 = vsel %vm1044_vm9, %v1309_v61, %v1305_v59  ;;  %586 = vadd.xlane.f32.xlu0 %v585_v58  ;;  %v605_v4 = vpop.xlane.xlu1 %604  ;;  %v474_v58 = vld [vmem:[%s2696_s25 + $0x348] sm:$0xff]  ;;  %v459_v59 = vld [vmem:[%s2696_s25 + $0x2d0] sm:$0xff] }
  0xc6   : > { %v560_v5 = vpop.xlane.xlu0 %559  ;;  %v1240_v8 = vrot.slane %v605_v4, %v2970_v26  ;;  %v768_v4 = vsel %vm497_vm0, %v459_v59, 0.0 }
  0xc7   : > { %v1166_v9 = vrot.slane %v560_v5, %v2988_v49 }
  0xc8   : > { %v1241_v13 = vsel %vm1058_vm11, %v1240_v8, %v1236_v52  ;;  %721 = vadd.xlane.f32.xlu1 %v720_v6  ;;  %v723_v52 = vsel %vm497_vm0, %v444_v44, 0.0  ;;  %v384_v8 = vld [vmem:[%s2696_s25 + $0x78] sm:$0xff] }
  0xc9   : > { %v1167_v14 = vsel %vm1065_vm12, %v1166_v9, %v1162_v39  ;;  %676 = vadd.xlane.f32.xlu0 %v675_v7  ;;  %v692_v15 = vpop.xlane.xlu1 %691  ;;  %v588_v39 = vsel %vm497_vm0, %v399_v33, 0.0  ;;  %v3053_v7 = vsub.s32 %v1074_v60, %v2926_v46  ;;  %v489_v9 = vld [vmem:[%s2696_s25 + $0x3c0] sm:$0xff] }
  0xca   : > { %v650_v16 = vpop.xlane.xlu0 %649  ;;  %v1384_v29 = vrot.slane %v692_v15, %v2936_v55 }
  0xcb   : > { %v1314_v19 = vrot.slane %v650_v16, %v2946_v0 }
  0xcc   : > { %811 = vadd.xlane.f32.xlu1 %v810_v17  ;;  %v415_v17 = vld [vmem:[%s2696_s25 + $0x170] sm:$0xff] }
  0xcd   : > { %v1315_v23 = vsel %vm1051_vm10, %v1314_v19, %v1310_v3  ;;  %766 = vadd.xlane.f32.xlu0 %v765_v18  ;;  %v515_v24 = vpop.xlane.xlu1 %514  ;;  %v813_v3 = vsel %vm497_vm0, %v474_v58, 0.0  ;;  %v400_v18 = vld [vmem:[%s2696_s25 + $0xf8] sm:$0xff] }
  0xce   : > { %v695_v25 = vpop.xlane.xlu0 %694  ;;  %v1071_v30 = vrot.slane %v515_v24, %v3015_v20  ;;  %v636_v24 = vsel %vm497_vm0, %v415_v17, 0.0 }
  0xcf   : > { %v1388_v31 = vrot.slane %v695_v25, %v2939_v56  ;;  %v591_v25 = vsel %vm497_vm0, %v400_v18, 0.0 }
  0xd0   : > { %v1073_v34 = vsel %vm1072_vm13, %v1071_v30, %v1066_v2  ;;  %541 = vadd.xlane.f32.xlu1 %v540_v27  ;;  %v430_v30 = vld [vmem:[%s2696_s25 + $0x1e8] sm:$0xff] }
  0xd1   : > { %v1389_v35 = vsel %vm1044_vm9, %v1388_v31, %v1384_v29  ;;  %856 = vadd.xlane.f32.xlu0 %v855_v28  ;;  %v608_v36 = vpop.xlane.xlu1 %607  ;;  %v445_v29 = vld [vmem:[%s2696_s25 + $0x260] sm:$0xff] }
  0xd2   : > { %v563_v37 = vpop.xlane.xlu0 %562  ;;  %v1245_v40 = vrot.slane %v608_v36, %v2988_v49  ;;  %v681_v36 = vsel %vm497_vm0, %v430_v30, 0.0 }
  0xd3   : > { %v1171_v42 = vrot.slane %v563_v37, %v3015_v20  ;;  %v475_v37 = vld [vmem:[%s2696_s25 + $0x350] sm:$0xff] }
  0xd4   : > { %v1246_v47 = vsel %vm1065_vm12, %v1245_v40, %v1241_v13  ;;  %634 = vadd.xlane.f32.xlu1 %v633_v38  ;;  %v543_v13 = vsel %vm497_vm0, %v384_v8, 0.0  ;;  %v460_v38 = vld [vmem:[%s2696_s25 + $0x2d8] sm:$0xff]  ;;  %v816_v44 = vsel %vm497_vm0, %v475_v37, 0.0 }
  0xd5   : > { %v1172_v48 = vsel %vm1072_vm13, %v1171_v42, %v1167_v14  ;;  %589 = vadd.xlane.f32.xlu0 %v588_v39  ;;  %v698_v50 = vpop.xlane.xlu1 %697  ;;  %v858_v14 = vsel %vm497_vm0, %v489_v9, 0.0  ;;  %v1081_v39 = vadd.s32 4294967240, %v2922_v43  ;;  %v771_v45 = vsel %vm497_vm0, %v460_v38, 0.0 }
  0xd6   : > { %v653_v51 = vpop.xlane.xlu0 %652  ;;  %v1393_v54 = vrot.slane %v698_v50, %v2946_v0 }
  0xd7   : > { %v1319_v57 = vrot.slane %v653_v51, %v2970_v26  ;;  %v3086_v50 = vsub.s32 %v1081_v39, %v2926_v46  ;;  %v416_v51 = vld [vmem:[%s2696_s25 + $0x178] sm:$0xff]  ;;  %v447_v39 = vld [vmem:[%s2696_s25 + $0x270] sm:$0xff] }
  0xd8   : > { %v3045_v61 = vsel %vm1051_vm10, %v1393_v54, %v1389_v35  ;;  %724 = vadd.xlane.f32.xlu1 %v723_v52  ;;  %v726_v35 = vsel %vm497_vm0, %v445_v29, 0.0  ;;  %v490_v52 = vld [vmem:[%s2696_s25 + $0x3c8] sm:$0xff]  ;;  %v639_v58 = vsel %vm497_vm0, %v416_v51, 0.0  ;;  %v1088_v29 = vadd.s32 4294967232, %v2922_v43 }
  0xd9   : > { %v1320_v62 = vsel %vm1058_vm11, %v1319_v57, %v1315_v23  ;;  %679 = vadd.xlane.f32.xlu0 %v678_v53  ;;  %v743_v1 = vpop.xlane.xlu1 %742  ;;  %v861_v59 = vsel %vm497_vm0, %v490_v52, 0.0 }
  0xda   : > { %v740_v2 = vpop.xlane.xlu0 %739  ;;  %v1467_v5 = vrot.slane %v743_v1, %v2939_v56  ;;  %v446_v1 = vld [vmem:[%s2696_s25 + $0x268] sm:$0xff] }
  0xdb   : > { %v1463_v6 = vrot.slane %v740_v2, %v2936_v55  ;;  %v431_v2 = vld [vmem:[%s2696_s25 + $0x1f0] sm:$0xff]  ;;  %v729_v8 = vsel %vm497_vm0, %v446_v1, 0.0 }
  0xdc   : > { %814 = vadd.xlane.f32.xlu1 %v813_v3  ;;  %v684_v9 = vsel %vm497_vm0, %v431_v2, 0.0  ;;  %v463_v2 = vld [vmem:[%s2696_s25 + $0x2f0] sm:$0xff] }
  0xdd   : > { %v3058_v10 = vsel %vm1044_vm9, %v1467_v5, %v1463_v6  ;;  %769 = vadd.xlane.f32.xlu0 %v768_v4  ;;  %v566_v11 = vpop.xlane.xlu1 %565 }
  0xde   : > { %v518_v12 = vpop.xlane.xlu0 %517  ;;  %v1176_v15 = vrot.slane %v566_v11, %v3053_v7 }
  0xdf   : > { %v1078_v16 = vrot.slane %v518_v12, %v3053_v7 }
  0xe0   : > { %v1177_v19 = vsel %vm1079_vm14, %v1176_v15, %v1172_v48  ;;  %544 = vadd.xlane.f32.xlu1 %v543_v13  ;;  %v476_v13 = vld [vmem:[%s2696_s25 + $0x358] sm:$0xff] }
  0xe1   : > { %v1080_v21 = vsel %vm1079_vm14, %v1078_v16, %v1073_v34  ;;  %859 = vadd.xlane.f32.xlu0 %v858_v14  ;;  %v656_v22 = vpop.xlane.xlu1 %655  ;;  %v461_v14 = vld [vmem:[%s2696_s25 + $0x2e0] sm:$0xff] }
  0xe2   : > { %v611_v23 = vpop.xlane.xlu0 %610  ;;  %v1324_v27 = vrot.slane %v656_v22, %v2988_v49  ;;  %v819_v22 = vsel %vm497_vm0, %v476_v13, 0.0 }
  0xe3   : > { %v1250_v28 = vrot.slane %v611_v23, %v3015_v20  ;;  %v774_v23 = vsel %vm497_vm0, %v461_v14, 0.0 }
  0xe4   : > { %v1325_v31 = vsel %vm1065_vm12, %v1324_v27, %v1320_v62  ;;  %637 = vadd.xlane.f32.xlu1 %v636_v24  ;;  %v432_v27 = vld [vmem:[%s2696_s25 + $0x1f8] sm:$0xff] }
  0xe5   : > { %v1251_v32 = vsel %vm1072_vm13, %v1250_v28, %v1246_v47  ;;  %592 = vadd.xlane.f32.xlu0 %v591_v25  ;;  %v746_v33 = vpop.xlane.xlu1 %745  ;;  %v491_v28 = vld [vmem:[%s2696_s25 + $0x3d0] sm:$0xff] }
  0xe6   : > { %v701_v34 = vpop.xlane.xlu0 %700  ;;  %v1472_v15 = vrot.slane %v746_v33, %v2946_v0  ;;  %v864_v37 = vsel %vm497_vm0, %v491_v28, 0.0 }
  0xe7   : > { %v1398_v16 = vrot.slane %v701_v34, %v2970_v26 }
  0xe8   : > { %727 = vadd.xlane.f32.xlu1 %v726_v35  ;;  %v1473_v30 = vsel %vm1051_vm10, %v1472_v15, %v3058_v10  ;;  %v3132_v10 = vsub.s32 %v1088_v29, %v2926_v46  ;;  %v493_v15 = vld [vmem:[%s2696_s25 + $0x3e0] sm:$0xff] }
  0xe9   : > { %682 = vadd.xlane.f32.xlu0 %v681_v36  ;;  %v791_v40 = vpop.xlane.xlu1 %790  ;;  %v687_v36 = vsel %vm497_vm0, %v432_v27, 0.0 }
  0xea   : > { %v788_v42 = vpop.xlane.xlu0 %787  ;;  %v1546_v47 = vrot.slane %v791_v40, %v2939_v56 }
  0xeb   : > { %v1542_v48 = vrot.slane %v788_v42, %v2936_v55 }
  0xec   : > { %817 = vadd.xlane.f32.xlu1 %v816_v44 }
  0xed   : > { %v1547_v53 = vsel %vm1044_vm9, %v1546_v47, %v1542_v48  ;;  %772 = vadd.xlane.f32.xlu0 %v771_v45  ;;  %v569_v54 = vpop.xlane.xlu1 %568  ;;  %v732_v47 = vsel %vm497_vm0, %v447_v39, 0.0 }
  0xee   : > { %v521_v57 = vpop.xlane.xlu0 %520  ;;  %v1181_v60 = vrot.slane %v569_v54, %v3086_v50  ;;  %v492_v54 = vld [vmem:[%s2696_s25 + $0x3d8] sm:$0xff] }
  0xef   : > { %v1085_v62 = vrot.slane %v521_v57, %v3086_v50  ;;  %v477_v57 = vld [vmem:[%s2696_s25 + $0x360] sm:$0xff] }
  0xf0   : > { %v3098_v3 = vsel %vm1086_vm15, %v1181_v60, %v1177_v19  ;;  %640 = vadd.xlane.f32.xlu1 %v639_v58 }
  0xf1   : > { %v1087_v4 = vsel %vm1086_vm15, %v1085_v62, %v1080_v21  ;;  %862 = vadd.xlane.f32.xlu0 %v861_v59  ;;  %v659_v5 = vpop.xlane.xlu1 %658  ;;  %v867_v62 = vsel %vm497_vm0, %v492_v54, 0.0  ;;  %v887_v54 = vld [vmem:[%s3636_s1 + $0x28] sm:$0xff] }
  0xf2   : > { %v614_v6 = vpop.xlane.xlu0 %613  ;;  %v1329_v11 = vrot.slane %v659_v5, %v3015_v20  ;;  %v448_v5 = vld [vmem:[%s2696_s25 + $0x278] sm:$0xff] }
  0xf3   : > { %v1255_v12 = vrot.slane %v614_v6, %v3053_v7 }
  0xf4   : > { %v3110_v17 = vsel %vm1072_vm13, %v1329_v11, %v1325_v31  ;;  %730 = vadd.xlane.f32.xlu1 %v729_v8  ;;  %v1399_v31 = vsel %vm1058_vm11, %v1398_v16, %v3045_v61  ;;  %v462_v61 = vld [vmem:[%s2696_s25 + $0x2e8] sm:$0xff]  ;;  %v780_v11 = vsel %vm497_vm0, %v463_v2, 0.0 }
  0xf5   : > { %v1256_v18 = vsel %vm1079_vm14, %v1255_v12, %v1251_v32  ;;  %685 = vadd.xlane.f32.xlu0 %v684_v9  ;;  %v749_v19 = vpop.xlane.xlu1 %748  ;;  %v777_v45 = vsel %vm497_vm0, %v462_v61, 0.0  ;;  %v735_v12 = vsel %vm497_vm0, %v448_v5, 0.0  ;;  %v478_v16 = vld [vmem:[%s2696_s25 + $0x368] sm:$0xff]  ;;  %v888_v5 = vld [vmem:[%s3636_s1 + $0x30] sm:$0xff] }
  0xf6   : > { %v704_v21 = vpop.xlane.xlu0 %703  ;;  %v1477_v24 = vrot.slane %v749_v19, %v2970_v26  ;;  %v825_v27 = vsel %vm497_vm0, %v478_v16, 0.0 }
  0xf7   : > { %v1403_v25 = vrot.slane %v704_v21, %v2988_v49  ;;  %v882_v21 = vld [vmem:[%s3636_s1] sm:$0xff] }
  0xf8   : > { %v3125_v32 = vsel %vm1058_vm11, %v1477_v24, %v1473_v30  ;;  %820 = vadd.xlane.f32.xlu1 %v819_v22  ;;  %v883_v22 = vld [vmem:[%s3636_s1 + $0x8] sm:$0xff] }
  0xf9   : > { %v1404_v33 = vsel %vm1065_vm12, %v1403_v25, %v1399_v31  ;;  %775 = vadd.xlane.f32.xlu0 %v774_v23  ;;  %v836_v34 = vpop.xlane.xlu1 %835  ;;  %v870_v25 = vsel %vm497_vm0, %v493_v15, 0.0  ;;  %v2368_v28 = vpack.c.bf16 %v883_v22, %v882_v21  ;;  %v479_v31 = vld [vmem:[%s2696_s25 + $0x370] sm:$0xff]  ;;  %v1102_v15 = vadd.s32 4294967216, %v2922_v43  ;;  %v890_v21 = vld [vmem:[%s3636_s1 + $0x40] sm:$0xff]  ;;  %v891_v22 = vld [vmem:[%s3636_s1 + $0x48] sm:$0xff] }
  0xfa   : > { %v794_v35 = vpop.xlane.xlu0 %793  ;;  %v1621_v48 = vrot.slane %v836_v34, %v2936_v55  ;;  %v822_v55 = vsel %vm497_vm0, %v477_v57, 0.0  ;;  %v828_v39 = vsel %vm497_vm0, %v479_v31, 0.0  ;;  %v893_v31 = vld [vmem:[%s3636_s1 + $0x58] sm:$0xff] }
  0xfb   : > { %v1551_v38 = vrot.slane %v794_v35, %v2946_v0  ;;  %2369 = vmatpush3.bf16.msra.mxu0 %v2368_v28 }
  0xfc   : > { %688 = vadd.xlane.f32.xlu1 %v687_v36  ;;  %v884_v36 = vld [vmem:[%s3636_s1 + $0x10] sm:$0xff]  ;;  %2370 = vmatprep.subr.bf16.mxu0 %v2586_v63 }
  0xfd   : > { %v1552_v40 = vsel %vm1051_vm10, %v1551_v38, %v1547_v53  ;;  %865 = vadd.xlane.f32.xlu0 %v864_v37  ;;  %v524_v42 = vpop.xlane.xlu1 %523  ;;  %v885_v37 = vld [vmem:[%s3636_s1 + $0x18] sm:$0xff] }
  0xfe   : > { %v839_v44 = vpop.xlane.xlu0 %838  ;;  %v1092_v51 = vrot.slane %v524_v42, %v3132_v10 }
  0xff   : > { %v1625_v52 = vrot.slane %v839_v44, %v2939_v56 }
 0x100   : > { %v1094_v53 = vsel %vm1093_vm5, %v1092_v51, %v1087_v4  ;;  %778 = vadd.xlane.f32.xlu1 %v777_v45  ;;  %v480_v45 = vld [vmem:[%s2696_s25 + $0x378] sm:$0xff] }
 0x101   : > { %v1626_v58 = vsel %vm1044_vm9, %v1625_v52, %v1621_v48  ;;  %733 = vadd.xlane.f32.xlu0 %v732_v47  ;;  %v617_v59 = vpop.xlane.xlu1 %616  ;;  %vm1100_vm9 = vcmask 654912   ;;  %v494_v47 = vld [vmem:[%s2696_s25 + $0x3e8] sm:$0xff]  ;;  %v886_v52 = vld [vmem:[%s3636_s1 + $0x20] sm:$0xff] }
 0x102   : > { %v572_v60 = vpop.xlane.xlu0 %571  ;;  %v1260_v1 = vrot.slane %v617_v59, %v3086_v50  ;;  %v831_v59 = vsel %vm497_vm0, %v480_v45, 0.0 }
 0x103   : > { %v1186_v56 = vrot.slane %v572_v60, %v3132_v10  ;;  %v873_v60 = vsel %vm497_vm0, %v494_v47, 0.0 }
 0x104   : > { %v3153_v4 = vsel %vm1086_vm15, %v1260_v1, %v1256_v18  ;;  %868 = vadd.xlane.f32.xlu1 %v867_v62  ;;  %v1095_v18 = vadd.s32 4294967224, %v2922_v43  ;;  %v496_v1 = vld [vmem:[%s2696_s25 + $0x3f8] sm:$0xff] }
 0x105   : > { %v3157_v6 = vsel %vm1093_vm5, %v1186_v56, %v3098_v3  ;;  %823 = vadd.xlane.f32.xlu0 %v822_v55  ;;  %v707_v8 = vpop.xlane.xlu1 %706  ;;  %v495_v55 = vld [vmem:[%s2696_s25 + $0x3f0] sm:$0xff] }
 0x106   : > { %v662_v9 = vpop.xlane.xlu0 %661  ;;  %v1408_v13 = vrot.slane %v707_v8, %v3015_v20  ;;  %v3184_v30 = vsub.s32 %v1095_v18, %v2926_v46  ;;  %v889_v8 = vld [vmem:[%s3636_s1 + $0x38] sm:$0xff] }
 0x107   : > { %v1334_v14 = vrot.slane %v662_v9, %v3053_v7 }
 0x108   : > { %v3167_v3 = vsel %vm1072_vm13, %v1408_v13, %v1404_v33  ;;  %781 = vadd.xlane.f32.xlu1 %v780_v11  ;;  %v464_v33 = vld [vmem:[%s2696_s25 + $0x2f8] sm:$0xff]  ;;  %v879_v13 = vsel %vm497_vm0, %v496_v1, 0.0 }
 0x109   : > { %v3171_v19 = vsel %vm1079_vm14, %v1334_v14, %v3110_v17  ;;  %736 = vadd.xlane.f32.xlu0 %v735_v12  ;;  %v797_v23 = vpop.xlane.xlu1 %796  ;;  %v876_v12 = vsel %vm497_vm0, %v495_v55, 0.0 }
 0x10a   : > { %v752_v24 = vpop.xlane.xlu0 %751  ;;  %v1556_v17 = vrot.slane %v797_v23, %v2970_v26 }
 0x10b   : > { %v1482_v29 = vrot.slane %v752_v24, %v2988_v49 }
 0x10c   : > { %v3189_v34 = vsel %vm1058_vm11, %v1556_v17, %v1552_v40  ;;  %871 = vadd.xlane.f32.xlu1 %v870_v25  ;;  %v783_v40 = vsel %vm497_vm0, %v464_v33, 0.0  ;;  %v2380_v25 = vpack.c.bf16 %v891_v22, %v890_v21  ;;  %vm1107_vm0 = vcmask 720512  }
 0x10d   : > { %v3193_v35 = vsel %vm1065_vm12, %v1482_v29, %v3125_v32  ;;  %826 = vadd.xlane.f32.xlu0 %v825_v27  ;;  %v527_v38 = vpop.xlane.xlu1 %526  ;;  %v2371_v32 = vpack.c.bf16 %v885_v37, %v884_v36  ;;  %v892_v29 = vld [vmem:[%s3636_s1 + $0x50] sm:$0xff] }
 0x10e   : > { %v842_v61 = vpop.xlane.xlu0 %841  ;;  %v1099_v42 = vrot.slane %v527_v38, %v3184_v30  ;;  %v2383_v37 = vpack.c.bf16 %v893_v31, %v892_v29 }
 0x10f   : > { %v1630_v44 = vrot.slane %v842_v61, %v2946_v0  ;;  %2372 = vmatpush3.bf16.msra.mxu0 %v2371_v32 }
 0x110   : > { %v1101_v48 = vsel %vm1100_vm9, %v1099_v42, %v1094_v53  ;;  %829 = vadd.xlane.f32.xlu1 %v828_v39  ;;  %2373 = vmatprep.subr.bf16.mxu0 %v2586_v63  ;;  %v2374_v53 = vpack.c.bf16 %v887_v54, %v886_v52  ;;  %v894_v39 = vld [vmem:[%s3636_s1 + $0x60] sm:$0xff]  ;;  %v897_v52 = vld [vmem:[%s3636_s1 + $0x78] sm:$0xff] }
 0x111   : > { %v1631_v51 = vsel %vm1051_vm10, %v1630_v44, %v1626_v58  ;;  %784 = vadd.xlane.f32.xlu0 %v783_v40  ;;  %v620_v0 = vpop.xlane.xlu1 %619  ;;  %v895_v40 = vld [vmem:[%s3636_s1 + $0x68] sm:$0xff]  ;;  %vm1114_vm10 = vcmask 786112  }
 0x112   : > { %v575_v57 = vpop.xlane.xlu0 %574  ;;  %v1265_v58 = vrot.slane %v620_v0, %v3132_v10  ;;  %v2386_v44 = vpack.c.bf16 %v895_v40, %v894_v39 }
 0x113   : > { %v1191_v62 = vrot.slane %v575_v57, %v3184_v30  ;;  %2375 = vmatpush3.bf16.msra.mxu0 %v2374_v53  ;;  %v1109_v53 = vadd.s32 4294967208, %v2922_v43 }
 0x114   : > { %v1266_v56 = vsel %vm1093_vm5, %v1265_v58, %v3153_v4  ;;  %832 = vadd.xlane.f32.xlu1 %v831_v59  ;;  %2376 = vmatprep.subr.bf16.mxu0 %v2586_v63  ;;  %v2377_v4 = vpack.c.bf16 %v889_v8, %v888_v5 }
 0x115   : > { %v1192_v2 = vsel %vm1100_vm9, %v1191_v62, %v3157_v6  ;;  %874 = vadd.xlane.f32.xlu0 %v873_v60  ;;  %v710_v9 = vpop.xlane.xlu1 %709  ;;  %v3297_v5 = vsub.s32 %v1109_v53, %v2926_v46 }
 0x116   : > { %v665_v11 = vpop.xlane.xlu0 %664  ;;  %v1413_v6 = vrot.slane %v710_v9, %v3053_v7 }
 0x117   : > { %v1339_v14 = vrot.slane %v665_v11, %v3086_v50  ;;  %2378 = vmatpush3.bf16.msra.mxu0 %v2377_v4 }
 0x118   : > { %v1414_v16 = vsel %vm1079_vm14, %v1413_v6, %v3167_v3  ;;  %880 = vadd.xlane.f32.xlu1 %v879_v13  ;;  %2379 = vmatprep.subr.bf16.mxu0 %v2586_v63 }
 0x119   : > { %v1340_v18 = vsel %vm1086_vm15, %v1339_v14, %v3171_v19  ;;  %877 = vadd.xlane.f32.xlu0 %v876_v12  ;;  %v800_v23 = vpop.xlane.xlu1 %799  ;;  %v3253_v19 = vsub.s32 %v1102_v15, %v2926_v46 }
 0x11a   : > { %v755_v24 = vpop.xlane.xlu0 %754  ;;  %v1561_v3 = vrot.slane %v800_v23, %v2988_v49 }
 0x11b   : > { %v1487_v27 = vrot.slane %v755_v24, %v3015_v20  ;;  %2381 = vmatpush3.bf16.msra.mxu0 %v2380_v25 }
 0x11c   : > { %v1562_v28 = vsel %vm1065_vm12, %v1561_v3, %v3189_v34  ;;  %2382 = vmatprep.subr.bf16.mxu0 %v2586_v63 }
 0x11d   : > { %v1488_v17 = vsel %vm1072_vm13, %v1487_v27, %v3193_v35  ;;  %v530_v33 = vpop.xlane.xlu1 %529  ;;  %v1116_v27 = vadd.s32 4294967200, %v2922_v43 }
 0x11e   : > { %v845_v36 = vpop.xlane.xlu0 %844  ;;  %v1106_v38 = vrot.slane %v530_v33, %v3253_v19 }
 0x11f   : > { %v1635_v34 = vrot.slane %v845_v36, %v2970_v26  ;;  %2384 = vmatpush3.bf16.msra.mxu0 %v2383_v37  ;;  %v3317_v37 = vsub.s32 %v1116_v27, %v2926_v46 }
 0x120   : > { %v1108_v35 = vsel %vm1107_vm0, %v1106_v38, %v1101_v48  ;;  %2385 = vmatprep.subr.bf16.mxu0 %v2586_v63 }
 0x121   : > { %v1636_v61 = vsel %vm1058_vm11, %v1635_v34, %v1631_v51  ;;  %v623_v32 = vpop.xlane.xlu1 %622  ;;  %v896_v51 = vld [vmem:[%s3636_s1 + $0x70] sm:$0xff]  ;;  %vm1121_vm11 = vcmask 851712  }
 0x122   : > { %v578_v42 = vpop.xlane.xlu0 %577  ;;  %v1270_v26 = vrot.slane %v623_v32, %v3184_v30  ;;  %v2389_v57 = vpack.c.bf16 %v897_v52, %v896_v51 }
 0x123   : > { %v1196_v45 = vrot.slane %v578_v42, %v3253_v19  ;;  %2387 = vmatpush3.bf16.msra.mxu0 %v2386_v44 }
 0x124   : > { %v1271_v47 = vsel %vm1100_vm9, %v1270_v26, %v1266_v56  ;;  %2388 = vmatprep.subr.bf16.mxu0 %v2586_v63 }
 0x125   : > { %v1197_v48 = vsel %vm1107_vm0, %v1196_v45, %v1192_v2  ;;  %v713_v54 = vpop.xlane.xlu1 %712 }
 0x126   : > { %v668_v0 = vpop.xlane.xlu0 %667  ;;  %v1418_v59 = vrot.slane %v713_v54, %v3086_v50 }
 0x127   : > { %v1344_v60 = vrot.slane %v668_v0, %v3132_v10  ;;  %2390 = vmatpush3.bf16.msra.mxu0 %v2389_v57  ;;  %v1123_v57 = vadd.s32 4294967192, %v2922_v43 }
 0x128   : > { %v1419_v58 = vsel %vm1086_vm15, %v1418_v59, %v1414_v16  ;;  %2415 = vmatprep.subr.bf16.mxu0 %v2586_v63 }
 0x129   : > { %v1345_v62 = vsel %vm1093_vm5, %v1344_v60, %v1340_v18  ;;  %v803_v55 = vpop.xlane.xlu1 %802 }
 0x12a   : > { %v758_v1 = vpop.xlane.xlu0 %757  ;;  %v1566_v56 = vrot.slane %v803_v55, %v3015_v20 }
 0x12b   : > { %v1492_v2 = vrot.slane %v758_v1, %v3053_v7  ;;  %v3337_v1 = vsub.s32 %v1123_v57, %v2926_v46 }
 0x12c   : > { %v1567_v8 = vsel %vm1072_vm13, %v1566_v56, %v1562_v28 }
 0x12d   : > { %v1493_v9 = vsel %vm1079_vm14, %v1492_v2, %v1488_v17  ;;  %v533_v11 = vpop.xlane.xlu1 %532 }
 0x12e   : > { %v848_v12 = vpop.xlane.xlu0 %847  ;;  %v1113_v13 = vrot.slane %v533_v11, %v3297_v5 }
 0x12f   : > { %v1640_v4 = vrot.slane %v848_v12, %v2988_v49 }
 0x130   : > { %v1115_v6 = vsel %vm1114_vm10, %v1113_v13, %v1108_v35 }
 0x131   : > { %v1641_v14 = vsel %vm1065_vm12, %v1640_v4, %v1636_v61  ;;  %v626_v15 = vpop.xlane.xlu1 %625  ;;  %vm1128_vm12 = vcmask 917312  }
 0x132   : > { %v581_v16 = vpop.xlane.xlu0 %580  ;;  %v1275_v18 = vrot.slane %v626_v15, %v3253_v19 }
 0x133   : > { %v1201_v21 = vrot.slane %v581_v16, %v3297_v5 }
 0x134   : > { %v1276_v22 = vsel %vm1107_vm0, %v1275_v18, %v1271_v47 }
 0x135   : > { %v1202_v23 = vsel %vm1114_vm10, %v1201_v21, %v1197_v48  ;;  %v716_v24 = vpop.xlane.xlu1 %715 }
 0x136   : > { %v671_v25 = vpop.xlane.xlu0 %670  ;;  %v1423_v3 = vrot.slane %v716_v24, %v3132_v10 }
 0x137   : > { %v1349_v49 = vrot.slane %v671_v25, %v3184_v30 }
 0x138   : > { %v1424_v28 = vsel %vm1093_vm5, %v1423_v3, %v1419_v58 }
 0x139   : > { %v1350_v17 = vsel %vm1100_vm9, %v1349_v49, %v1345_v62  ;;  %v806_v29 = vpop.xlane.xlu1 %805  ;;  %v1130_v49 = vadd.s32 4294967184, %v2922_v43 }
 0x13a   : > { %v761_v31 = vpop.xlane.xlu0 %760  ;;  %v1571_v33 = vrot.slane %v806_v29, %v3053_v7 }
 0x13b   : > { %v1497_v36 = vrot.slane %v761_v31, %v3086_v50 }
 0x13c   : > { %v1572_v38 = vsel %vm1079_vm14, %v1571_v33, %v1567_v8 }
 0x13d   : > { %v1498_v34 = vsel %vm1086_vm15, %v1497_v36, %v1493_v9  ;;  %v536_v35 = vpop.xlane.xlu1 %535  ;;  %v3361_v36 = vsub.s32 %v1130_v49, %v2926_v46 }
 0x13e   : > { %v851_v61 = vpop.xlane.xlu0 %850  ;;  %v1120_v39 = vrot.slane %v536_v35, %v3317_v37 }
 0x13f   : > { %v1645_v40 = vrot.slane %v851_v61, %v3015_v20 }
 0x140   : > { %v1122_v32 = vsel %vm1121_vm11, %v1120_v39, %v1115_v6  ;;  %v3341_v8 = vpop.f32.mrb[0].mxu1 }
 0x141   : > { %v1646_v42 = vsel %vm1072_vm13, %v1645_v40, %v1641_v14  ;;  %v629_v44 = vpop.xlane.xlu1 %628  ;;  %v2331_v4 = vpop.f32.mrb[1].mxu1  ;;  %vm1135_vm13 = vcmask 982912  }
 0x142   : > { %v584_v26 = vpop.xlane.xlu0 %583  ;;  %v1280_v45 = vrot.slane %v629_v44, %v3297_v5 }
 0x143   : > { %v1206_v47 = vrot.slane %v584_v26, %v3317_v37 }
 0x144   : > { %v1281_v48 = vsel %vm1114_vm10, %v1280_v45, %v1276_v22 }
 0x145   : > { %v1207_v51 = vsel %vm1121_vm11, %v1206_v47, %v1202_v23  ;;  %v719_v52 = vpop.xlane.xlu1 %718 }
 0x146   : > { %v674_v54 = vpop.xlane.xlu0 %673  ;;  %v1428_v0 = vrot.slane %v719_v52, %v3184_v30 }
 0x147   : > { %v1354_v20 = vrot.slane %v674_v54, %v3253_v19 }
 0x148   : > { %v1429_v59 = vsel %vm1100_vm9, %v1428_v0, %v1424_v28 }
 0x149   : > { %v1355_v60 = vsel %vm1107_vm0, %v1354_v20, %v1350_v17  ;;  %v809_v53 = vpop.xlane.xlu1 %808 }
 0x14a   : > { %v764_v58 = vpop.xlane.xlu0 %763  ;;  %v1576_v62 = vrot.slane %v809_v53, %v3086_v50 }
 0x14b   : > { %v1502_v55 = vrot.slane %v764_v58, %v3132_v10 }
 0x14c   : > { %v1577_v56 = vsel %vm1086_vm15, %v1576_v62, %v1572_v38 }
 0x14d   : > { %v1503_v2 = vsel %vm1093_vm5, %v1502_v55, %v1498_v34  ;;  %v539_v9 = vpop.xlane.xlu1 %538 }
 0x14e   : > { %v854_v11 = vpop.xlane.xlu0 %853  ;;  %v1127_v12 = vrot.slane %v539_v9, %v3337_v1 }
 0x14f   : > { %v1650_v13 = vrot.slane %v854_v11, %v3053_v7 }
 0x150   : > { %v1129_v6 = vsel %vm1128_vm12, %v1127_v12, %v1122_v32 }
 0x151   : > { %v1651_v14 = vsel %vm1079_vm14, %v1650_v13, %v1646_v42  ;;  %v632_v15 = vpop.xlane.xlu1 %631  ;;  %vm1142_vm14 = vcmask 1048512  }
 0x152   : > { %v587_v16 = vpop.xlane.xlu0 %586  ;;  %v1285_v18 = vrot.slane %v632_v15, %v3317_v37 }
 0x153   : > { %v1211_v21 = vrot.slane %v587_v16, %v3337_v1 }
 0x154   : > { %v1286_v22 = vsel %vm1121_vm11, %v1285_v18, %v1281_v48  ;;  %v1137_v48 = vadd.s32 4294967176, %v2922_v43 }
 0x155   : > { %v1212_v23 = vsel %vm1128_vm12, %v1211_v21, %v1207_v51  ;;  %v722_v24 = vpop.xlane.xlu1 %721 }
 0x156   : > { %v677_v25 = vpop.xlane.xlu0 %676  ;;  %v1433_v3 = vrot.slane %v722_v24, %v3253_v19  ;;  %v3381_v54 = vsub.s32 %v1137_v48, %v2926_v46 }
 0x157   : > { %v1359_v7 = vrot.slane %v677_v25, %v3297_v5 }
 0x158   : > { %v3355_v27 = vsel %vm1107_vm0, %v1433_v3, %v1429_v59 }
 0x159   : > { %v1360_v28 = vsel %vm1114_vm10, %v1359_v7, %v1355_v60  ;;  %v812_v17 = vpop.xlane.xlu1 %811 }
 0x15a   : > { %v767_v29 = vpop.xlane.xlu0 %766  ;;  %v1581_v31 = vrot.slane %v812_v17, %v3132_v10 }
 0x15b   : > { %v1507_v33 = vrot.slane %v767_v29, %v3184_v30 }
 0x15c   : > { %v3364_v38 = vsel %vm1093_vm5, %v1581_v31, %v1577_v56 }
 0x15d   : > { %v3367_v34 = vsel %vm1100_vm9, %v1507_v33, %v1503_v2  ;;  %v542_v35 = vpop.xlane.xlu1 %541 }
 0x15e   : > { %v857_v61 = vpop.xlane.xlu0 %856  ;;  %v1134_v39 = vrot.slane %v542_v35, %v3361_v36 }
 0x15f   : > { %v1655_v40 = vrot.slane %v857_v61, %v3086_v50 }
 0x160   : > { %v1136_v32 = vsel %vm1135_vm13, %v1134_v39, %v1129_v6 }
 0x161   : > { %v3373_v42 = vsel %vm1086_vm15, %v1655_v40, %v1651_v14  ;;  %v635_v44 = vpop.xlane.xlu1 %634 }
 0x162   : > { %v590_v26 = vpop.xlane.xlu0 %589  ;;  %v1290_v11 = vrot.slane %v635_v44, %v3337_v1 }
 0x163   : > { %v1216_v20 = vrot.slane %v590_v26, %v3361_v36 }
 0x164   : > { %v1291_v6 = vsel %vm1128_vm12, %v1290_v11, %v1286_v22 }
 0x165   : > { %v725_v45 = vpop.xlane.xlu1 %724  ;;  %v1217_v43 = vsel %vm1135_vm13, %v1216_v20, %v1212_v23 }
 0x166   : > { %v680_v47 = vpop.xlane.xlu0 %679  ;;  %v1438_v44 = vrot.slane %v725_v45, %v3297_v5 }
 0x167   : > { %v1364_v24 = vrot.slane %v680_v47, %v3317_v37 }
 0x168   : > { %v1439_v20 = vsel %vm1114_vm10, %v1438_v44, %v3355_v27 }
 0x169   : > { %v3376_v51 = vpop.xlane.xlu1 %814  ;;  %v1365_v22 = vsel %vm1121_vm11, %v1364_v24, %v1360_v28 }
 0x16a   : > { %v3378_v52 = vpop.xlane.xlu0 %769  ;;  %v1586_v27 = vrot.slane %v3376_v51, %v3184_v30 }
 0x16b   : > { %v1512_v45 = vrot.slane %v3378_v52, %v3253_v19 }
 0x16d   : > { %v545_v0 = vpop.xlane.xlu1 %544  ;;  %v1513_v52 = vsel %vm1107_vm0, %v1512_v45, %v3367_v34  ;;  %v1958_v45 = vld [vmem:[%s3641_s6 + $0x18] sm:$0xff] }
 0x16e   : > { %v3383_v50 = vpop.xlane.xlu0 %859  ;;  %v1141_v57 = vrot.slane %v545_v0, %v3381_v54 }
 0x16f   : > { %v1660_v34 = vrot.slane %v3383_v50, %v3132_v10 }
 0x170   : > { %v1143_v58 = vsel %vm1142_vm14, %v1141_v57, %v1136_v32 }
 0x171   : > { %v638_v59 = vpop.xlane.xlu1 %637 }
 0x172   : > { %v593_v60 = vpop.xlane.xlu0 %592  ;;  %v1295_v12 = vrot.slane %v638_v59, %v3361_v36 }
 0x173   : > { %v1221_v53 = vrot.slane %v593_v60, %v3381_v54 }
 0x174   : > { %v1296_v15 = vsel %vm1135_vm13, %v1295_v12, %v1291_v6 }
 0x175   : > { %v1222_v62 = vsel %vm1142_vm14, %v1221_v53, %v1217_v43  ;;  %v728_v55 = vpop.xlane.xlu1 %727 }
 0x176   : > { %v1698_v46 = vsel %vm1697_vm1, %v1222_v62, %v1143_v58  ;;  %v683_v56 = vpop.xlane.xlu0 %682  ;;  %v1443_v26 = vrot.slane %v728_v55, %v3317_v37  ;;  %vm3650_vm1 = vmmov 0  }
 0x177   : > { %v1369_v7 = vrot.slane %v683_v56, %v3337_v1 }
 0x178   : > { %v1444_v57 = vsel %vm1121_vm11, %v1443_v26, %v1439_v20 }
 0x179   : > { %v3392_v2 = vpop.xlane.xlu1 %817  ;;  %v1370_v31 = vsel %vm1128_vm12, %v1369_v7, %v1365_v22 }
 0x17a   : > { %v773_v9 = vpop.xlane.xlu0 %772  ;;  %v1591_v6 = vrot.slane %v3392_v2, %v3253_v19 }
 0x17b   : > { %v1517_v62 = vrot.slane %v773_v9, %v3297_v5 }
 0x17d   : > { %v641_v13 = vpop.xlane.xlu1 %640 }
 0x17e   : > { %v3396_v4 = vpop.xlane.xlu0 %862  ;;  %v1300_v14 = vrot.slane %v641_v13, %v3381_v54 }
 0x180   : > { %v1301_v16 = vsel %vm1142_vm14, %v1300_v14, %v1296_v15  ;;  %v1518_v14 = vsel %vm1114_vm10, %v1517_v62, %v1513_v52  ;;  %v1587_v15 = vsel %vm1100_vm9, %v1586_v27, %v3364_v38  ;;  %v1665_v38 = vrot.slane %v3396_v4, %v3184_v30  ;;  %v1960_v62 = vld [vmem:[%s3641_s6 + $0x28] sm:$0xff]  ;;  %v1961_v27 = vld [vmem:[%s3641_s6 + $0x30] sm:$0xff]  ;;  %v1966_v52 = vld [vmem:[%s3641_s6 + $0x58] sm:$0xff] }
 0x181   : > { %v1700_v18 = vsel %vm1699_vm2, %v1301_v16, %v1698_v46  ;;  %v731_v21 = vpop.xlane.xlu1 %730  ;;  %v1661_v30 = vsel %vm1093_vm5, %v1660_v34, %v3373_v42 }
 0x182   : > { %v686_v23 = vpop.xlane.xlu0 %685  ;;  %v1448_v48 = vrot.slane %v731_v21, %v3337_v1 }
 0x183   : > { %v1374_v49 = vrot.slane %v686_v23, %v3361_v36 }
 0x184   : > { %v1449_v53 = vsel %vm1128_vm12, %v1448_v48, %v1444_v57  ;;  %v1956_v48 = vld [vmem:[%s3641_s6 + $0x8] sm:$0xff] }
 0x185   : > { %v821_v25 = vpop.xlane.xlu1 %820  ;;  %v1375_v35 = vsel %vm1135_vm13, %v1374_v49, %v1370_v31 }
 0x186   : > { %v776_v3 = vpop.xlane.xlu0 %775  ;;  %v1596_v51 = vrot.slane %v821_v25, %v3297_v5  ;;  %v1592_v25 = vsel %vm1107_vm0, %v1591_v6, %v1587_v15  ;;  %v2202_v15 = vld [vmem:[%s3640_s5] ss:$0 sm:$0xff] }
 0x187   : > { %v1522_v55 = vrot.slane %v776_v3, %v3317_v37 }
 0x188   : > { %v1597_v22 = vsel %vm1114_vm10, %v1596_v51, %v1592_v25 }
 0x189   : > { %v689_v17 = vpop.xlane.xlu1 %688  ;;  %v1523_v16 = vsel %vm1121_vm11, %v1522_v55, %v1518_v14  ;;  %v1968_v14 = vld [vmem:[%s3641_s6 + $0x68] sm:$0xff] }
 0x18a   : > { %v3407_v29 = vpop.xlane.xlu0 %865  ;;  %v1379_v33 = vrot.slane %v689_v17, %v3381_v54 }
 0x18b   : > { %v1670_v10 = vrot.slane %v3407_v29, %v3253_v19  ;;  %v1666_v19 = vsel %vm1100_vm9, %v1665_v38, %v1661_v30 }
 0x18c   : > { %v1380_v61 = vsel %vm1142_vm14, %v1379_v33, %v1375_v35 }
 0x18d   : > { %v1702_v39 = vsel %vm1701_vm3, %v1380_v61, %v1700_v18  ;;  %v779_v40 = vpop.xlane.xlu1 %778 }
 0x18e   : > { %v734_v32 = vpop.xlane.xlu0 %733  ;;  %v1527_v13 = vrot.slane %v779_v40, %v3337_v1 }
 0x18f   : > { %v1453_v0 = vrot.slane %v734_v32, %v3361_v36  ;;  %v1671_v32 = vsel %vm1107_vm0, %v1670_v10, %v1666_v19 }
 0x190   : > { %v1528_v2 = vsel %vm1128_vm12, %v1527_v13, %v1523_v16  ;;  %v1965_v13 = vld [vmem:[%s3641_s6 + $0x50] sm:$0xff] }
 0x191   : > { %v869_v28 = vpop.xlane.xlu1 %868  ;;  %v1454_v58 = vsel %vm1135_vm13, %v1453_v0, %v1449_v53  ;;  %v2431_v6 = vpack.c.bf16 %v1966_v52, %v1965_v13  ;;  %v1969_v16 = vld [vmem:[%s3641_s6 + $0x70] sm:$0xff] }
 0x192   : > { %v824_v47 = vpop.xlane.xlu0 %823  ;;  %v1675_v17 = vrot.slane %v869_v28, %v3297_v5 }
 0x193   : > { %v1601_v18 = vrot.slane %v824_v47, %v3317_v37  ;;  %v1955_v47 = vld [vmem:[%s3641_s6] sm:$0xff] }
 0x194   : > { %v1676_v26 = vsel %vm1114_vm10, %v1675_v17, %v1671_v32 }
 0x195   : > { %v782_v59 = vpop.xlane.xlu1 %781  ;;  %v1602_v31 = vsel %vm1121_vm11, %v1601_v18, %v1597_v22  ;;  %v1970_v18 = vld [vmem:[%s3641_s6 + $0x78] sm:$0xff] }
 0x196   : > { %v737_v60 = vpop.xlane.xlu0 %736  ;;  %v1532_v9 = vrot.slane %v782_v59, %v3361_v36 }
 0x197   : > { %v1458_v43 = vrot.slane %v737_v60, %v3381_v54  ;;  %v2416_v60 = vpack.c.bf16 %v1956_v48, %v1955_v47 }
 0x198   : > { %v1533_v7 = vsel %vm1135_vm13, %v1532_v9, %v1528_v2  ;;  %v1967_v9 = vld [vmem:[%s3641_s6 + $0x60] sm:$0xff] }
 0x199   : > { %v1459_v46 = vsel %vm1142_vm14, %v1458_v43, %v1454_v58  ;;  %v872_v11 = vpop.xlane.xlu1 %871  ;;  %v1957_v43 = vld [vmem:[%s3641_s6 + $0x10] sm:$0xff]  ;;  %v2434_v51 = vpack.c.bf16 %v1968_v14, %v1967_v9  ;;  %v2201_v2 = vld [vmem:[%s3637_s2] ss:$0 sm:$0xff] }
 0x19a   : > { %v1704_v56 = vsel %vm1703_vm4, %v1459_v46, %v1702_v39  ;;  %v827_v12 = vpop.xlane.xlu0 %826  ;;  %v1680_v4 = vrot.slane %v872_v11, %v3317_v37  ;;  %v1964_v11 = vld [vmem:[%s3641_s6 + $0x48] sm:$0xff] }
 0x19b   : > { %v1606_v24 = vrot.slane %v827_v12, %v3337_v1 }
 0x19d   : > { %v830_v21 = vpop.xlane.xlu1 %829  ;;  %v1607_v39 = vsel %vm1128_vm12, %v1606_v24, %v1602_v31 }
 0x19e   : > { %v785_v23 = vpop.xlane.xlu0 %784  ;;  %v1611_v49 = vrot.slane %v830_v21, %v3361_v36  ;;  %v1951_v21 = vadd.f32 %v2202_v15, %v3341_v8  ;;  %v2203_v8 = vld [vmem:[%s3642_s7] ss:$0 sm:$0xff] }
 0x19f   : > { %v1537_v3 = vrot.slane %v785_v23, %v3381_v54  ;;  %v2437_v23 = vpack.c.bf16 %v1970_v18, %v1969_v16 }
 0x1a0   : > { %v1612_v29 = vsel %vm1135_vm13, %v1611_v49, %v1607_v39  ;;  %v1954_v34 = vmax.f32 %v1951_v21, 0.0 }
 0x1a1   : > { %v1538_v50 = vsel %vm1142_vm14, %v1537_v3, %v1533_v7  ;;  %v833_v33 = vpop.xlane.xlu1 %832 }
 0x1a2   : > { %v875_v35 = vpop.xlane.xlu0 %874  ;;  %v1706_v61 = vsel %vm1705_vm6, %v1538_v50, %v1704_v56  ;;  %v1616_v40 = vrot.slane %v833_v33, %v3381_v54  ;;  %v1963_v56 = vld [vmem:[%s3641_s6 + $0x40] sm:$0xff] }
 0x1a3   : > { %v1685_v5 = vrot.slane %v875_v35, %v3337_v1  ;;  %v1681_v1 = vsel %vm1121_vm11, %v1680_v4, %v1676_v26  ;;  %v2428_v12 = vpack.c.bf16 %v1964_v11, %v1963_v56 }
 0x1a4   : > { %v1617_v44 = vsel %vm1142_vm14, %v1616_v40, %v1612_v29 }
 0x1a5   : > { %v881_v42 = vpop.xlane.xlu1 %880  ;;  %v1708_v37 = vsel %vm1707_vm7, %v1617_v44, %v1706_v61  ;;  %v1686_v57 = vsel %vm1128_vm12, %v1685_v5, %v1681_v1 }
 0x1a6   : > { %v878_v28 = vpop.xlane.xlu0 %877  ;;  %v1695_v20 = vrot.slane %v881_v42, %v3381_v54  ;;  %v1959_v54 = vld [vmem:[%s3641_s6 + $0x20] sm:$0xff] }
 0x1a7   : > { %v1690_v0 = vrot.slane %v878_v28, %v3361_v36  ;;  %v2419_v36 = vpack.c.bf16 %v1958_v45, %v1957_v43  ;;  %v2422_v46 = vpack.c.bf16 %v1960_v62, %v1959_v54 }
 0x1a9   : > { %v1691_v59 = vsel %vm1135_vm13, %v1690_v0, %v1686_v57 }
 0x1aa   : > { %v1696_v53 = vsel %vm1142_vm14, %v1695_v20, %v1691_v59 }
 0x1ab   : > { %v1710_v58 = vsel %vm1709_vm8, %v1696_v53, %v1708_v37 }
 0x1ac   : > { %2295 = vmatmul.mubr.f32.vlgmr.msra.gmra.mrb[0].mxu0 %v1710_v58 }
 0x1ad   : > { %2417 = vmatpush3.bf16.msra.mxu0 %v2416_v60  ;;  %2364 = vmatprep.mubr.msk.f32.mxu0 %vm3650_vm1, %v2588_v41  ;;  %v1962_v41 = vld [vmem:[%s3641_s6 + $0x38] sm:$0xff] }
 0x1ae   : > { %2418 = vmatprep.subr.bf16.mxu0 %v2586_v63  ;;  %v2425_v55 = vpack.c.bf16 %v1962_v41, %v1961_v27 }
 0x1b1   : > { %2420 = vmatpush3.bf16.msra.mxu0 %v2419_v36 }
 0x1b2   : > { %2421 = vmatprep.subr.bf16.mxu0 %v2586_v63 }
 0x1b5   : > { %2423 = vmatpush3.bf16.msra.mxu0 %v2422_v46 }
 0x1b6   : > { %2424 = vmatprep.subr.bf16.mxu0 %v2586_v63 }
 0x1b9   : > { %2426 = vmatpush3.bf16.msra.mxu0 %v2425_v55 }
 0x1ba   : > { %2427 = vmatprep.subr.bf16.mxu0 %v2586_v63 }
 0x1bd   : > { %2429 = vmatpush3.bf16.msra.mxu0 %v2428_v12 }
 0x1be   : > { %2430 = vmatprep.subr.bf16.mxu0 %v2586_v63 }
 0x1c1   : > { %2432 = vmatpush3.bf16.msra.mxu0 %v2431_v6 }
 0x1c2   : > { %2433 = vmatprep.subr.bf16.mxu0 %v2586_v63 }
 0x1c5   : > { %2435 = vmatpush3.bf16.msra.mxu0 %v2434_v51 }
 0x1c6   : > { %2436 = vmatprep.subr.bf16.mxu0 %v2586_v63 }
 0x1c9   : > { %2438 = vmatpush3.bf16.msra.mxu0 %v2437_v23 }
 0x1cc   : > { %2365 = vmatmul.mubr.f32.vlgmr.msra.gmra.mrb[2].mxu0 %v1954_v34 }
 0x27f   : > { %v1778_v24 = vpop.f32.mrb[0].mxu0 }
 0x280   : > { %v1779_v3 = vadd.f32 %v2201_v2, %v1778_v24  ;;  %v2296_v25 = vpop.f32.mrb[1].mxu0 }
 0x282   : > { %v1782_v38 = vmul.f32 %v1779_v3, %v1779_v3 }
 0x284   : > { %1783 = vadd.xlane.f32.xlu0 %v1782_v38 }
 0x29f   : > { %v2044_v63 = vpop.f32.mrb[2].mxu0 }
 0x2a0   : > { %v2045_v7 = vadd.f32 %v2203_v8, %v2044_v63  ;;  %v2366_v49 = vpop.f32.mrb[3].mxu0 }
 0x2a2   : > { %v2048_v22 = vmul.f32 %v2045_v7, %v2045_v7 }
 0x2a4   : > { %2049 = vadd.xlane.f32.xlu1 %v2048_v22 }
 0x311   : > { %v1784_v10 = vpop.xlane.xlu0 %1783 }
 0x312   : > { %v1785_v50 = vmax.f32 %v1784_v10, 1e-24 }
 0x314   : > { %2486 = vrsqrt.f32 %v1785_v50 }
 0x31e   : > { %v2487_v17 = vpop.eup %2486 }
 0x31f   : > { %v1787_v31 = vmul.f32 %v2487_v17, %v1779_v3 }
 0x321   : > { %1788 = vst [vmem:[%s348_s17] sm:$0xff] %v1787_v31 }
 0x322   : > { %2503 = shalt.err (!%p2500_p3)
}
 0x323   : > { %s2504_s17 = scalar_lea.hbm %s3559_s21, 128  ;;  %s2508_s27 = scalar_lea.hbm %s3643_s8, 256 }
 0x324   : > { %p2505_p4 = scmp.ne.s32.totalorder %s3559_s21, %s2504_s17  ;;  %p2509_p9 = scmp.lt.u32.totalorder %s3559_s21, %s3643_s8 }
 0x325   : > { %p2510_p10 = scmp.lt.u32.totalorder %s2508_s27, %s2504_s17  ;;  %p2512_p12 = scmp.lt.u32.totalorder %s2504_s17, %s3559_s21 }
 0x326   : > { %p2506_p7 = pnand %p2505_p4, %p2679_p5 }
 0x327   : > { %p2511_p11 = por %p2510_p10, %p2509_p9 }
 0x328   : > { %p2507_p8 = pneg %p2506_p7 }
 0x329   : > { %p2513_p13 = por %p2512_p12, %p2511_p11 }
 0x32b   : > { %p2514_p0 = pnand %p2513_p13, %p2507_p8 }
 0x32d   : > { %2517 = shalt.err (!%p2514_p0)
}
 0x32e   : > { %2439 = dma.vmem_to_hbm [thread:$0]  (%p2679_p5), %s3561_s22, 128, %s3559_s21, %s2056_s26  }
 0x32f   : > { %s3651_s14 = sshll.u32 %s3548_s29, 3  ;;  %s3652_s17 = sshll.u32 %s2662_s13, 7 }
 0x330   : > { %s355_s16 = scalar_lea.vmem [#allocation4], %s3651_s14  ;;  %s3592_s27 = scalar_lea.hbm %s3644_s9, %s3652_s17 }
 0x331   : > { %v2050_v33 = vpop.xlane.xlu1 %2049  ;;  %s2087_s24 = sshll.u32 %s355_s16, 4  ;;  %s2061_s22 = scalar_lea.sflag [#allocation5], %s3548_s29  ;;  %s3594_s24 = int_to_ptr.vmem [resolvable:$true] %s2087_s24 }
 0x332   : > { %v2051_v35 = vmax.f32 %v2050_v33, 1e-24  ;;  %s2518_s21 = scalar_lea.vmem %s3594_s24, 128  ;;  %s2590_s26 = smov [#allocation4]  }
 0x333   : > { %p2519_p1 = scmp.ne.s32.totalorder %s3594_s24, %s2518_s21  ;;  %s2522_s28 = sshll.u32 %s2590_s26, 4  ;;  %s2523_s28 = int_to_ptr.vmem [resolvable:$false] %s2522_s28 }
 0x334   : > { %2488 = vrsqrt.f32 %v2051_v35  ;;  %s2524_s13 = scalar_lea.vmem %s2523_s28, 256  ;;  %p2525_p4 = scmp.lt.s32.totalorder %s3594_s24, %s2523_s28 }
 0x335   : > { %p2520_p2 = pnand %p2519_p1, %p2679_p5  ;;  %p2526_p7 = scmp.lt.s32.totalorder %s2524_s13, %s2518_s21 }
 0x337   : > { %p2521_p3 = pneg %p2520_p2  ;;  %p2527_p8 = por %p2526_p7, %p2525_p4 }
 0x339   : > { %p2528_p9 = pnand %p2527_p8, %p2521_p3 }
 0x33e   : > { %v2489_v61 = vpop.eup %2488 }
 0x33f   : > { %v2053_v30 = vmul.f32 %v2489_v61, %v2045_v7 }
 0x341   : > { %2054 = vst [vmem:[%s355_s16] sm:$0xff] %v2053_v30 }
 0x342   : > { %2531 = shalt.err (!%p2528_p9)
}
 0x343   : > { %s2532_s29 = scalar_lea.hbm %s3592_s27, 128  ;;  %s2536_s17 = scalar_lea.hbm %s3644_s9, 256 }
 0x344   : > { %p2533_p10 = scmp.ne.s32.totalorder %s3592_s27, %s2532_s29  ;;  %p2537_p13 = scmp.lt.u32.totalorder %s3592_s27, %s3644_s9 }
 0x345   : > { %p2538_p0 = scmp.lt.u32.totalorder %s2536_s17, %s2532_s29  ;;  %p2540_p2 = scmp.lt.u32.totalorder %s2532_s29, %s3592_s27 }
 0x346   : > { %p2534_p11 = pnand %p2533_p10, %p2679_p5 }
 0x347   : > { %p2539_p1 = por %p2538_p0, %p2537_p13 }
 0x348   : > { %p2535_p12 = pneg %p2534_p11 }
 0x349   : > { %p2541_p3 = por %p2540_p2, %p2539_p1 }
 0x34b   : > { %p2542_p4 = pnand %p2541_p3, %p2535_p12 }
 0x34d   : > { %2545 = shalt.err (!%p2542_p4)
}
 0x34e   : > { %2440 = dma.vmem_to_hbm [thread:$0]  (%p2679_p5), %s3594_s24, 128, %s3592_s27, %s2061_s22  }
 0x34f PF: > { %p2450_p7 = scmp.ge.s32.totalorder %s2584_s12, 2  ;;  %s2099_s21 = sand.u32 1, %s2572_s30  }
 0x350   : > { %s2100_s26 = scalar_lea.sflag [#allocation3], %s2099_s21 }
 0x351   : > { %p2444_p8 = pnand %p2450_p7, %p2683_p6 }
 0x353   : > { %2563 = dma.done.wait (!%p2444_p8), %s2100_s26, 128  }
 0x354   : > { %2565 = vsyncadd (!%p2444_p8), %s2100_s26, 4294967168  ;;  %s2109_s28 = scalar_lea.sflag [#allocation5], %s2099_s21 }
 0x355   : > { %2567 = dma.done.wait (!%p2444_p8), %s2109_s28, 128  }
 0x356   : > { %2569 = vsyncadd (!%p2444_p8), %s2109_s28, 4294967168  ;;  %p23_p5 = scmp.ge.s32.totalorder %s2666_s15, 4   ;;  %s3653_s30 = smov %s2576_s10 }
 0x357   : > { %s3654_s10 = smov %s2580_s11  ;;  %s3655_s11 = smov %s2677_s18 }
 0x358   : > { %s3656_s12 = smov %s2666_s15  ;;  %25 = sbr.rel (!%p23_p5) target bundleno = 5 (0x5), region = 107 }
 0x35f   :  { %2114 = vsyncpa [#allocation3], 1 }
 0x360   :  { %2116 = vsyncpa [#allocation3 + $0x1], 1 }
 0x361   :  { %2117 = vsyncpa [#allocation5], 1 }
 0x362   :  { %2119 = vsyncpa [#allocation5 + $0x1], 1 }

</bundles_post_ra>
